<compile_context>
chip_gen: v6e
topology: v6e:2x2x1
jax: 0.10.0
libtpu: 0.0.40
codegen_flags: <defaults>
</compile_context>

<pallas_src>
import functools

import jax
import jax.numpy as jnp
from jax.experimental import pallas as pl
from jax.experimental.pallas import tpu as pltpu

_STD_CLAMP_MAX = 3.0
_STD_CLAMP_MIN = -10.0
_HEAD_PAD = 128          # mu / log_sigma each get their own 128-lane tile


def _softplus(x):
    # numerically stable softplus (beta=1) written with exp/log only (Mosaic-friendly)
    return jnp.maximum(x, 0.0) + jnp.log(1.0 + jnp.exp(-jnp.abs(x)))


# ----------------------------------------------------------------------------
# The single fused kernel (everything VMEM-resident)
# ----------------------------------------------------------------------------
def _vae_forward_kernel(x_ref, eps_ref,
                        mc1_ref, bc1_ref, mc2_ref, bc2_ref,
                        wf1_ref, bf1_ref, wf2_ref, bf2_ref,
                        wh_ref, bh_ref,
                        wd1_ref, bd1_ref, wd2_ref, bd2_ref,
                        mt1_ref, bt1_ref, mt2_ref, bt2_ref,
                        out_ref, mu_ref, sp_ref, *, z_dim):
    def dense(a, w_ref, b_ref):
        # bf16 operands on the MXU, f32 accumulation, f32 bias epilogue
        return jnp.dot(a.astype(jnp.bfloat16), w_ref[...],
                       preferred_element_type=jnp.float32) + b_ref[...]

    relu = lambda v: jnp.maximum(v, 0.0)

    # ---------------- encoder ----------------
    h = relu(dense(x_ref[...], mc1_ref, bc1_ref))        # conv1   -> (B, c1*8*8)
    h = relu(dense(h, mc2_ref, bc2_ref))                  # conv2   -> (B, c2*4*4)
    h = relu(dense(h, wf1_ref, bf1_ref))                  # enc_fc1
    h = relu(dense(h, wf2_ref, bf2_ref))                  # enc_fc2

    # ------- merged mu | log_sigma head (tile-aligned halves) -------
    head = dense(h, wh_ref, bh_ref)                       # (B, 2*_HEAD_PAD)
    mu = head[:, :z_dim]
    log_sigma = head[:, _HEAD_PAD:_HEAD_PAD + z_dim]
    sigma = _softplus(jnp.clip(log_sigma, _STD_CLAMP_MIN, _STD_CLAMP_MAX))
    z = mu + sigma * eps_ref[...]                         # rsample: mu + sigma * eps

    # ---------------- decoder ----------------
    d = relu(dense(z, wd1_ref, bd1_ref))                  # dec_fc1
    d = relu(dense(d, wd2_ref, bd2_ref))                  # dec_fc2
    d = relu(dense(d, mt1_ref, bt1_ref))                  # conv_transpose1
    o = dense(d, mt2_ref, bt2_ref)                        # conv_transpose2 (pre-sigmoid)

    out_ref[...] = 1.0 / (1.0 + jnp.exp(-o))              # exact sigmoid (exp on EUP)
    mu_ref[...] = mu
    sp_ref[...] = _softplus(log_sigma)                    # third forward() output


_WEIGHT_ORDER = ("mc1", "bc1", "mc2", "bc2", "wf1", "bf1", "wf2", "bf2",
                 "wh", "bh", "wd1", "bd1", "wd2", "bd2",
                 "mt1", "bt1", "mt2", "bt2")


def model_forward(prep, x, eps):
    """Full Model.forward.  `prep` comes from prepare_params (hoisted weight prep)."""
    B = x.shape[0]
    z_dim = eps.shape[1]
    x_flat = x.reshape(B, -1).astype(jnp.bfloat16)        # NCHW flatten (PyTorch order)
    args = [x_flat, eps.astype(jnp.float32)] + [prep[k] for k in _WEIGHT_ORDER]
    out_flat_dim = prep["mt2"].shape[1]

    def full(shape):
        return pl.BlockSpec(shape, lambda i: (0, 0))

    out_flat, mu, sp = pl.pallas_call(
        functools.partial(_vae_forward_kernel, z_dim=z_dim),
        out_shape=(jax.ShapeDtypeStruct((B, out_flat_dim), jnp.float32),
                   jax.ShapeDtypeStruct((B, z_dim), jnp.float32),
                   jax.ShapeDtypeStruct((B, z_dim), jnp.float32)),
        grid=(1,),
        in_specs=[full(a.shape) for a in args],
        out_specs=(full((B, out_flat_dim)), full((B, z_dim)), full((B, z_dim))),
        compiler_params=pltpu.CompilerParams(dimension_semantics=("arbitrary",)),
    )(*args)
    return out_flat.reshape(x.shape), mu, sp


# ----------------------------------------------------------------------------
# One-time parameter preparation (hoisted out of the per-forward path)
# ----------------------------------------------------------------------------
def _conv_as_matrix(w, stride, padding, in_shape):
    """Dense (in_flat, out_flat) matrix of a Conv2d, NCHW flatten on both sides.
    w: (C_out, C_in, kH, kW) — PyTorch Conv2d layout."""
    c_in, h, wd = in_shape
    f = c_in * h * wd
    eye = jnp.eye(f, dtype=jnp.float32).reshape(f, c_in, h, wd)
    y = jax.lax.conv_general_dilated(
        eye, w.astype(jnp.float32), (stride, stride),
        [(padding, padding), (padding, padding)],
        dimension_numbers=("NCHW", "OIHW", "NCHW"))
    return y.reshape(f, -1)


def _conv_transpose_as_matrix(w, stride, padding, output_padding, in_shape):
    """Dense (in_flat, out_flat) matrix of a ConvTranspose2d.
    w: (C_in, C_out, kH, kW) — PyTorch ConvTranspose2d layout."""
    c_in, h, wd = in_shape
    k = w.shape[-1]
    f = c_in * h * wd
    eye = jnp.eye(f, dtype=jnp.float32).reshape(f, c_in, h, wd)
    wf = jnp.flip(w, (-2, -1)).transpose(1, 0, 2, 3).astype(jnp.float32)
    lo = k - 1 - padding
    y = jax.lax.conv_general_dilated(
        eye, wf, (1, 1), [(lo, lo + output_padding), (lo, lo + output_padding)],
        lhs_dilation=(stride, stride),
        dimension_numbers=("NCHW", "OIHW", "NCHW"))
    return y.reshape(f, -1)


def prepare_params(p, *, in_ch, hw, c1, c2, feat_hw, z_dim):
    """Build the kernel-ready weight dict ONCE (conv->matrix lowering, transposes,
    merged head, bf16 casts, bias rows).  Never re-run per forward call."""
    bf = jnp.bfloat16
    h1, h2 = hw // 2, hw // 4
    assert h2 == feat_hw

    def brow(b):
        return b.reshape(1, -1).astype(jnp.float32)

    mc1 = _conv_as_matrix(p["enc_conv1_w"], 2, 1, (in_ch, hw, hw))
    mc2 = _conv_as_matrix(p["enc_conv2_w"], 2, 1, (c1, h1, h1))
    mt1 = _conv_transpose_as_matrix(p["dec_ct1_w"], 2, 1, 1, (c2, feat_hw, feat_hw))
    mt2 = _conv_transpose_as_matrix(p["dec_ct2_w"], 2, 1, 1, (c1, 2 * feat_hw, 2 * feat_hw))

    # merged mu | log_sigma head: each projector in its own 128-lane tile
    fc2_hidden = p["mu_w"].shape[1]
    wh = jnp.zeros((fc2_hidden, 2 * _HEAD_PAD), jnp.float32)
    wh = wh.at[:, :z_dim].set(p["mu_w"].T)
    wh = wh.at[:, _HEAD_PAD:_HEAD_PAD + z_dim].set(p["sigma_w"].T)
    bh = jnp.zeros((1, 2 * _HEAD_PAD), jnp.float32)
    bh = bh.at[0, :z_dim].set(p["mu_b"])
    bh = bh.at[0, _HEAD_PAD:_HEAD_PAD + z_dim].set(p["sigma_b"])

    return {
        "mc1": mc1.astype(bf), "bc1": brow(jnp.repeat(p["enc_conv1_b"], h1 * h1)),
        "mc2": mc2.astype(bf), "bc2": brow(jnp.repeat(p["enc_conv2_b"], h2 * h2)),
        "wf1": p["enc_fc1_w"].T.astype(bf), "bf1": brow(p["enc_fc1_b"]),
        "wf2": p["enc_fc2_w"].T.astype(bf), "bf2": brow(p["enc_fc2_b"]),
        "wh": wh.astype(bf), "bh": bh,
        "wd1": p["dec_fc1_w"].T.astype(bf), "bd1": brow(p["dec_fc1_b"]),
        "wd2": p["dec_fc2_w"].T.astype(bf), "bd2": brow(p["dec_fc2_b"]),
        "mt1": mt1.astype(bf), "bt1": brow(jnp.repeat(p["dec_ct1_b"], (2 * feat_hw) ** 2)),
        "mt2": mt2.astype(bf), "bt2": brow(jnp.repeat(p["dec_ct2_b"], (4 * feat_hw) ** 2)),
    }


# ----------------------------------------------------------------------------
# Deterministic PyTorch-layout parameters (fan-in uniform init)
# ----------------------------------------------------------------------------
def _init_wb(key, out_f, fan_in, shape_w):
    k1, k2 = jax.random.split(key)
    bound = 1.0 / jnp.sqrt(jnp.asarray(fan_in, jnp.float32))
    w = jax.random.uniform(k1, shape_w, jnp.float32, -bound, bound)
    b = jax.random.uniform(k2, (out_f,), jnp.float32, -bound, bound)
    return w, b


def init_params(key, *, in_ch=1, c1=8, c2=16, fc1_hidden=64, fc2_hidden=32,
                stochastic_dim=8, feat_hw=4):
    keys = jax.random.split(key, 10)
    flat = c2 * feat_hw * feat_hw
    p = {}
    p["enc_conv1_w"], p["enc_conv1_b"] = _init_wb(keys[0], c1, in_ch * 9, (c1, in_ch, 3, 3))
    p["enc_conv2_w"], p["enc_conv2_b"] = _init_wb(keys[1], c2, c1 * 9, (c2, c1, 3, 3))
    p["enc_fc1_w"], p["enc_fc1_b"] = _init_wb(keys[2], fc1_hidden, flat, (fc1_hidden, flat))
    p["enc_fc2_w"], p["enc_fc2_b"] = _init_wb(keys[3], fc2_hidden, fc1_hidden, (fc2_hidden, fc1_hidden))
    p["mu_w"], p["mu_b"] = _init_wb(keys[4], stochastic_dim, fc2_hidden, (stochastic_dim, fc2_hidden))
    p["sigma_w"], p["sigma_b"] = _init_wb(keys[5], stochastic_dim, fc2_hidden, (stochastic_dim, fc2_hidden))
    p["dec_fc1_w"], p["dec_fc1_b"] = _init_wb(keys[6], fc1_hidden, stochastic_dim, (fc1_hidden, stochastic_dim))
    p["dec_fc2_w"], p["dec_fc2_b"] = _init_wb(keys[7], flat, fc1_hidden, (flat, fc1_hidden))
    # ConvTranspose2d weights: (C_in, C_out, kH, kW)
    p["dec_ct1_w"], p["dec_ct1_b"] = _init_wb(keys[8], c1, c2 * 9, (c2, c1, 3, 3))
    p["dec_ct2_w"], p["dec_ct2_b"] = _init_wb(keys[9], in_ch, c1 * 9, (c1, in_ch, 3, 3))
    return p


# ----------------------------------------------------------------------------
# Pure-f32 JAX reference (true module semantics) — correctness check
# ----------------------------------------------------------------------------
def reference_forward(params, x, eps, *, c2=16, feat_hw=4):
    p = params

    def conv(xx, w, b, stride, pad):
        y = jax.lax.conv_general_dilated(
            xx, w, (stride, stride), [(pad, pad), (pad, pad)],
            dimension_numbers=("NCHW", "OIHW", "NCHW"))
        return y + b.reshape(1, -1, 1, 1)

    def convt(xx, w, b, stride, pad, opad):
        k = w.shape[-1]
        wf = jnp.flip(w, (-2, -1)).transpose(1, 0, 2, 3)
        lo = k - 1 - pad
        y = jax.lax.conv_general_dilated(
            xx, wf, (1, 1), [(lo, lo + opad), (lo, lo + opad)],
            lhs_dilation=(stride, stride),
            dimension_numbers=("NCHW", "OIHW", "NCHW"))
        return y + b.reshape(1, -1, 1, 1)

    def fc(h, w, b):
        return h @ w.T + b

    n = x.shape[0]
    h = jax.nn.relu(conv(x, p["enc_conv1_w"], p["enc_conv1_b"], 2, 1))
    h = jax.nn.relu(conv(h, p["enc_conv2_w"], p["enc_conv2_b"], 2, 1))
    h = h.reshape(n, -1)
    h = jax.nn.relu(fc(h, p["enc_fc1_w"], p["enc_fc1_b"]))
    h = jax.nn.relu(fc(h, p["enc_fc2_w"], p["enc_fc2_b"]))
    mu = fc(h, p["mu_w"], p["mu_b"])
    log_sigma = fc(h, p["sigma_w"], p["sigma_b"])
    sigma = _softplus(jnp.clip(log_sigma, _STD_CLAMP_MIN, _STD_CLAMP_MAX))
    z = mu + sigma * eps
    d = jax.nn.relu(fc(z, p["dec_fc1_w"], p["dec_fc1_b"]))
    d = jax.nn.relu(fc(d, p["dec_fc2_w"], p["dec_fc2_b"]))
    d = d.reshape(n, c2, feat_hw, feat_hw)
    d = jax.nn.relu(convt(d, p["dec_ct1_w"], p["dec_ct1_b"], 2, 1, 1))
    out = jax.nn.sigmoid(convt(d, p["dec_ct2_w"], p["dec_ct2_b"], 2, 1, 1))
    return out, mu, _softplus(log_sigma)


# ----------------------------------------------------------------------------
if __name__ == "__main__":
    batch, in_ch, hw = 2, 1, 16
    c1, c2, feat_hw = 8, 16, 4
    z_dim = 8

    key = jax.random.PRNGKey(0)
    kx, keps, kparam = jax.random.split(key, 3)

    x = jax.random.normal(kx, (batch, in_ch, hw, hw), jnp.float32)
    eps = jax.random.normal(keps, (batch, z_dim), jnp.float32)
    params = init_params(kparam, in_ch=in_ch, c1=c1, c2=c2,
                         stochastic_dim=z_dim, feat_hw=feat_hw)

    # one-time weight preprocessing (explicitly OUTSIDE the per-forward path)
    prep = prepare_params(params, in_ch=in_ch, hw=hw, c1=c1, c2=c2,
                          feat_hw=feat_hw, z_dim=z_dim)
    prep = jax.block_until_ready(prep)

    fwd = jax.jit(model_forward)
    out, mu, sp = fwd(prep, x, eps)
    jax.block_until_ready((out, mu, sp))

    assert out.shape == (batch, in_ch, hw, hw)
    assert mu.shape == (batch, z_dim)
    assert sp.shape == (batch, z_dim)
    assert bool(jnp.all(jnp.isfinite(out)))
    assert bool(jnp.all(jnp.isfinite(mu)))
    assert bool(jnp.all(jnp.isfinite(sp)))

    # correctness vs. the true-f32 reference (kernel uses bf16 MXU operands —
    # intentional, documented precision choice; 5e-2 abs tolerance)
    r_out, r_mu, r_sp = jax.jit(
        functools.partial(reference_forward, c2=c2, feat_hw=feat_hw))(params, x, eps)
    assert float(jnp.max(jnp.abs(out - r_out))) < 5e-2
    assert float(jnp.max(jnp.abs(mu - r_mu))) < 5e-2
    assert float(jnp.max(jnp.abs(sp - r_sp))) < 5e-2

    print("KERNEL_OK")
</pallas_src>

<mosaic_0001>
module attributes {stable_mosaic.version = 11 : i64} {
  func.func @_vae_forward_kernel(%arg0: i32, %arg1: memref<2x256xbf16, #tpu.memory_space<vmem>>, %arg2: memref<2x8xf32, #tpu.memory_space<vmem>>, %arg3: memref<256x512xbf16, #tpu.memory_space<vmem>>, %arg4: memref<1x512xf32, #tpu.memory_space<vmem>>, %arg5: memref<512x256xbf16, #tpu.memory_space<vmem>>, %arg6: memref<1x256xf32, #tpu.memory_space<vmem>>, %arg7: memref<256x64xbf16, #tpu.memory_space<vmem>>, %arg8: memref<1x64xf32, #tpu.memory_space<vmem>>, %arg9: memref<64x32xbf16, #tpu.memory_space<vmem>>, %arg10: memref<1x32xf32, #tpu.memory_space<vmem>>, %arg11: memref<32x256xbf16, #tpu.memory_space<vmem>>, %arg12: memref<1x256xf32, #tpu.memory_space<vmem>>, %arg13: memref<8x64xbf16, #tpu.memory_space<vmem>>, %arg14: memref<1x64xf32, #tpu.memory_space<vmem>>, %arg15: memref<64x256xbf16, #tpu.memory_space<vmem>>, %arg16: memref<1x256xf32, #tpu.memory_space<vmem>>, %arg17: memref<256x512xbf16, #tpu.memory_space<vmem>>, %arg18: memref<1x512xf32, #tpu.memory_space<vmem>>, %arg19: memref<512x256xbf16, #tpu.memory_space<vmem>>, %arg20: memref<1x256xf32, #tpu.memory_space<vmem>>, %arg21: memref<2x256xf32, #tpu.memory_space<vmem>>, %arg22: memref<2x8xf32, #tpu.memory_space<vmem>>, %arg23: memref<2x8xf32, #tpu.memory_space<vmem>>) attributes {dimension_semantics = [#tpu.dimension_semantics<arbitrary>], iteration_bounds = array<i64: 1>, scalar_prefetch = 0 : i64, scratch_operands = 0 : i64, tpu.core_type = #tpu.core_type<tc>, window_params = [{pipeline_mode = #tpu.pipeline_mode<synchronous>, transform_indices = @transform_0, window_bounds = array<i64: 2, 256>}, {pipeline_mode = #tpu.pipeline_mode<synchronous>, transform_indices = @transform_1, window_bounds = array<i64: 2, 8>}, {pipeline_mode = #tpu.pipeline_mode<synchronous>, transform_indices = @transform_2, window_bounds = array<i64: 256, 512>}, {pipeline_mode = #tpu.pipeline_mode<synchronous>, transform_indices = @transform_3, window_bounds = array<i64: 1, 512>}, {pipeline_mode = #tpu.pipeline_mode<synchronous>, transform_indices = @transform_4, window_bounds = array<i64: 512, 256>}, {pipeline_mode = #tpu.pipeline_mode<synchronous>, transform_indices = @transform_5, window_bounds = array<i64: 1, 256>}, {pipeline_mode = #tpu.pipeline_mode<synchronous>, transform_indices = @transform_6, window_bounds = array<i64: 256, 64>}, {pipeline_mode = #tpu.pipeline_mode<synchronous>, transform_indices = @transform_7, window_bounds = array<i64: 1, 64>}, {pipeline_mode = #tpu.pipeline_mode<synchronous>, transform_indices = @transform_8, window_bounds = array<i64: 64, 32>}, {pipeline_mode = #tpu.pipeline_mode<synchronous>, transform_indices = @transform_9, window_bounds = array<i64: 1, 32>}, {pipeline_mode = #tpu.pipeline_mode<synchronous>, transform_indices = @transform_10, window_bounds = array<i64: 32, 256>}, {pipeline_mode = #tpu.pipeline_mode<synchronous>, transform_indices = @transform_11, window_bounds = array<i64: 1, 256>}, {pipeline_mode = #tpu.pipeline_mode<synchronous>, transform_indices = @transform_12, window_bounds = array<i64: 8, 64>}, {pipeline_mode = #tpu.pipeline_mode<synchronous>, transform_indices = @transform_13, window_bounds = array<i64: 1, 64>}, {pipeline_mode = #tpu.pipeline_mode<synchronous>, transform_indices = @transform_14, window_bounds = array<i64: 64, 256>}, {pipeline_mode = #tpu.pipeline_mode<synchronous>, transform_indices = @transform_15, window_bounds = array<i64: 1, 256>}, {pipeline_mode = #tpu.pipeline_mode<synchronous>, transform_indices = @transform_16, window_bounds = array<i64: 256, 512>}, {pipeline_mode = #tpu.pipeline_mode<synchronous>, transform_indices = @transform_17, window_bounds = array<i64: 1, 512>}, {pipeline_mode = #tpu.pipeline_mode<synchronous>, transform_indices = @transform_18, window_bounds = array<i64: 512, 256>}, {pipeline_mode = #tpu.pipeline_mode<synchronous>, transform_indices = @transform_19, window_bounds = array<i64: 1, 256>}, {pipeline_mode = #tpu.pipeline_mode<synchronous>, transform_indices = @transform_20, window_bounds = array<i64: 2, 256>}, {pipeline_mode = #tpu.pipeline_mode<synchronous>, transform_indices = @transform_21, window_bounds = array<i64: 2, 8>}, {pipeline_mode = #tpu.pipeline_mode<synchronous>, transform_indices = @transform_22, window_bounds = array<i64: 2, 8>}]} {
    %c0 = arith.constant 0 : index
    %c0_0 = arith.constant 0 : index
    %0 = vector.load %arg1[%c0, %c0_0] : memref<2x256xbf16, #tpu.memory_space<vmem>>, vector<2x256xbf16>
    %c0_1 = arith.constant 0 : index
    %c0_2 = arith.constant 0 : index
    %1 = vector.load %arg3[%c0_1, %c0_2] : memref<256x512xbf16, #tpu.memory_space<vmem>>, vector<256x512xbf16>
    %cst = arith.constant dense<0.000000e+00> : vector<2x512xf32>
    %2 = tpu.matmul %0, %1, %cst {dimension_numbers = #tpu.dot_dimension_numbers<[1], [0], [0], [1], [0, 0, 1, 1], [], []>} : vector<2x256xbf16>, vector<256x512xbf16>, vector<2x512xf32> -> vector<2x512xf32>
    %c0_3 = arith.constant 0 : index
    %c0_4 = arith.constant 0 : index
    %3 = vector.load %arg4[%c0_3, %c0_4] : memref<1x512xf32, #tpu.memory_space<vmem>>, vector<1x512xf32>
    %4 = vector.broadcast %3 : vector<1x512xf32> to vector<2x512xf32>
    %5 = arith.addf %2, %4 : vector<2x512xf32>
    %cst_5 = arith.constant 0.000000e+00 : f32
    %6 = vector.broadcast %cst_5 : f32 to vector<2x512xf32>
    %7 = arith.maximumf %5, %6 : vector<2x512xf32>
    %8 = arith.truncf %7 : vector<2x512xf32> to vector<2x512xbf16>
    %c0_6 = arith.constant 0 : index
    %c0_7 = arith.constant 0 : index
    %9 = vector.load %arg5[%c0_6, %c0_7] : memref<512x256xbf16, #tpu.memory_space<vmem>>, vector<512x256xbf16>
    %cst_8 = arith.constant dense<0.000000e+00> : vector<2x256xf32>
    %10 = tpu.matmul %8, %9, %cst_8 {dimension_numbers = #tpu.dot_dimension_numbers<[1], [0], [0], [1], [0, 0, 1, 1], [], []>} : vector<2x512xbf16>, vector<512x256xbf16>, vector<2x256xf32> -> vector<2x256xf32>
    %c0_9 = arith.constant 0 : index
    %c0_10 = arith.constant 0 : index
    %11 = vector.load %arg6[%c0_9, %c0_10] : memref<1x256xf32, #tpu.memory_space<vmem>>, vector<1x256xf32>
    %12 = vector.broadcast %11 : vector<1x256xf32> to vector<2x256xf32>
    %13 = arith.addf %10, %12 : vector<2x256xf32>
    %cst_11 = arith.constant 0.000000e+00 : f32
    %14 = vector.broadcast %cst_11 : f32 to vector<2x256xf32>
    %15 = arith.maximumf %13, %14 : vector<2x256xf32>
    %16 = arith.truncf %15 : vector<2x256xf32> to vector<2x256xbf16>
    %c0_12 = arith.constant 0 : index
    %c0_13 = arith.constant 0 : index
    %17 = vector.load %arg7[%c0_12, %c0_13] : memref<256x64xbf16, #tpu.memory_space<vmem>>, vector<256x64xbf16>
    %cst_14 = arith.constant dense<0.000000e+00> : vector<2x64xf32>
    %18 = tpu.matmul %16, %17, %cst_14 {dimension_numbers = #tpu.dot_dimension_numbers<[1], [0], [0], [1], [0, 0, 1, 1], [], []>} : vector<2x256xbf16>, vector<256x64xbf16>, vector<2x64xf32> -> vector<2x64xf32>
    %c0_15 = arith.constant 0 : index
    %c0_16 = arith.constant 0 : index
    %19 = vector.load %arg8[%c0_15, %c0_16] : memref<1x64xf32, #tpu.memory_space<vmem>>, vector<1x64xf32>
    %20 = vector.broadcast %19 : vector<1x64xf32> to vector<2x64xf32>
    %21 = arith.addf %18, %20 : vector<2x64xf32>
    %cst_17 = arith.constant 0.000000e+00 : f32
    %22 = vector.broadcast %cst_17 : f32 to vector<2x64xf32>
    %23 = arith.maximumf %21, %22 : vector<2x64xf32>
    %24 = arith.truncf %23 : vector<2x64xf32> to vector<2x64xbf16>
    %c0_18 = arith.constant 0 : index
    %c0_19 = arith.constant 0 : index
    %25 = vector.load %arg9[%c0_18, %c0_19] : memref<64x32xbf16, #tpu.memory_space<vmem>>, vector<64x32xbf16>
    %cst_20 = arith.constant dense<0.000000e+00> : vector<2x32xf32>
    %26 = tpu.matmul %24, %25, %cst_20 {dimension_numbers = #tpu.dot_dimension_numbers<[1], [0], [0], [1], [0, 0, 1, 1], [], []>} : vector<2x64xbf16>, vector<64x32xbf16>, vector<2x32xf32> -> vector<2x32xf32>
    %c0_21 = arith.constant 0 : index
    %c0_22 = arith.constant 0 : index
    %27 = vector.load %arg10[%c0_21, %c0_22] : memref<1x32xf32, #tpu.memory_space<vmem>>, vector<1x32xf32>
    %28 = vector.broadcast %27 : vector<1x32xf32> to vector<2x32xf32>
    %29 = arith.addf %26, %28 : vector<2x32xf32>
    %cst_23 = arith.constant 0.000000e+00 : f32
    %30 = vector.broadcast %cst_23 : f32 to vector<2x32xf32>
    %31 = arith.maximumf %29, %30 : vector<2x32xf32>
    %32 = arith.truncf %31 : vector<2x32xf32> to vector<2x32xbf16>
    %c0_24 = arith.constant 0 : index
    %c0_25 = arith.constant 0 : index
    %33 = vector.load %arg11[%c0_24, %c0_25] : memref<32x256xbf16, #tpu.memory_space<vmem>>, vector<32x256xbf16>
    %cst_26 = arith.constant dense<0.000000e+00> : vector<2x256xf32>
    %34 = tpu.matmul %32, %33, %cst_26 {dimension_numbers = #tpu.dot_dimension_numbers<[1], [0], [0], [1], [0, 0, 1, 1], [], []>} : vector<2x32xbf16>, vector<32x256xbf16>, vector<2x256xf32> -> vector<2x256xf32>
    %c0_27 = arith.constant 0 : index
    %c0_28 = arith.constant 0 : index
    %35 = vector.load %arg12[%c0_27, %c0_28] : memref<1x256xf32, #tpu.memory_space<vmem>>, vector<1x256xf32>
    %36 = vector.broadcast %35 : vector<1x256xf32> to vector<2x256xf32>
    %37 = arith.addf %34, %36 : vector<2x256xf32>
    %38 = vector.extract_strided_slice %37 {offsets = [0, 0], sizes = [2, 8], strides = [1, 1]} : vector<2x256xf32> to vector<2x8xf32>
    %39 = vector.extract_strided_slice %37 {offsets = [0, 128], sizes = [2, 8], strides = [1, 1]} : vector<2x256xf32> to vector<2x8xf32>
    %cst_29 = arith.constant -1.000000e+01 : f32
    %cst_30 = arith.constant 3.000000e+00 : f32
    %40 = vector.broadcast %cst_29 : f32 to vector<2x8xf32>
    %41 = arith.maximumf %40, %39 : vector<2x8xf32>
    %42 = vector.broadcast %cst_30 : f32 to vector<2x8xf32>
    %43 = arith.minimumf %42, %41 : vector<2x8xf32>
    %cst_31 = arith.constant 0.000000e+00 : f32
    %44 = vector.broadcast %cst_31 : f32 to vector<2x8xf32>
    %45 = arith.maximumf %43, %44 : vector<2x8xf32>
    %46 = math.absf %43 : vector<2x8xf32>
    %cst_32 = arith.constant 0.000000e+00 : f32
    %47 = vector.broadcast %cst_32 : f32 to vector<2x8xf32>
    %48 = arith.subf %47, %46 : vector<2x8xf32>
    %49 = math.exp %48 : vector<2x8xf32>
    %cst_33 = arith.constant 1.000000e+00 : f32
    %50 = vector.broadcast %cst_33 : f32 to vector<2x8xf32>
    %51 = arith.addf %50, %49 : vector<2x8xf32>
    %52 = math.log %51 : vector<2x8xf32>
    %53 = arith.addf %45, %52 : vector<2x8xf32>
    %c0_34 = arith.constant 0 : index
    %c0_35 = arith.constant 0 : index
    %54 = vector.load %arg2[%c0_34, %c0_35] : memref<2x8xf32, #tpu.memory_space<vmem>>, vector<2x8xf32>
    %55 = arith.mulf %53, %54 : vector<2x8xf32>
    %56 = arith.addf %38, %55 : vector<2x8xf32>
    %57 = arith.truncf %56 : vector<2x8xf32> to vector<2x8xbf16>
    %c0_36 = arith.constant 0 : index
    %c0_37 = arith.constant 0 : index
    %58 = vector.load %arg13[%c0_36, %c0_37] : memref<8x64xbf16, #tpu.memory_space<vmem>>, vector<8x64xbf16>
    %cst_38 = arith.constant dense<0.000000e+00> : vector<2x64xf32>
    %59 = tpu.matmul %57, %58, %cst_38 {dimension_numbers = #tpu.dot_dimension_numbers<[1], [0], [0], [1], [0, 0, 1, 1], [], []>} : vector<2x8xbf16>, vector<8x64xbf16>, vector<2x64xf32> -> vector<2x64xf32>
    %c0_39 = arith.constant 0 : index
    %c0_40 = arith.constant 0 : index
    %60 = vector.load %arg14[%c0_39, %c0_40] : memref<1x64xf32, #tpu.memory_space<vmem>>, vector<1x64xf32>
    %61 = vector.broadcast %60 : vector<1x64xf32> to vector<2x64xf32>
    %62 = arith.addf %59, %61 : vector<2x64xf32>
    %cst_41 = arith.constant 0.000000e+00 : f32
    %63 = vector.broadcast %cst_41 : f32 to vector<2x64xf32>
    %64 = arith.maximumf %62, %63 : vector<2x64xf32>
    %65 = arith.truncf %64 : vector<2x64xf32> to vector<2x64xbf16>
    %c0_42 = arith.constant 0 : index
    %c0_43 = arith.constant 0 : index
    %66 = vector.load %arg15[%c0_42, %c0_43] : memref<64x256xbf16, #tpu.memory_space<vmem>>, vector<64x256xbf16>
    %cst_44 = arith.constant dense<0.000000e+00> : vector<2x256xf32>
    %67 = tpu.matmul %65, %66, %cst_44 {dimension_numbers = #tpu.dot_dimension_numbers<[1], [0], [0], [1], [0, 0, 1, 1], [], []>} : vector<2x64xbf16>, vector<64x256xbf16>, vector<2x256xf32> -> vector<2x256xf32>
    %c0_45 = arith.constant 0 : index
    %c0_46 = arith.constant 0 : index
    %68 = vector.load %arg16[%c0_45, %c0_46] : memref<1x256xf32, #tpu.memory_space<vmem>>, vector<1x256xf32>
    %69 = vector.broadcast %68 : vector<1x256xf32> to vector<2x256xf32>
    %70 = arith.addf %67, %69 : vector<2x256xf32>
    %cst_47 = arith.constant 0.000000e+00 : f32
    %71 = vector.broadcast %cst_47 : f32 to vector<2x256xf32>
    %72 = arith.maximumf %70, %71 : vector<2x256xf32>
    %73 = arith.truncf %72 : vector<2x256xf32> to vector<2x256xbf16>
    %c0_48 = arith.constant 0 : index
    %c0_49 = arith.constant 0 : index
    %74 = vector.load %arg17[%c0_48, %c0_49] : memref<256x512xbf16, #tpu.memory_space<vmem>>, vector<256x512xbf16>
    %cst_50 = arith.constant dense<0.000000e+00> : vector<2x512xf32>
    %75 = tpu.matmul %73, %74, %cst_50 {dimension_numbers = #tpu.dot_dimension_numbers<[1], [0], [0], [1], [0, 0, 1, 1], [], []>} : vector<2x256xbf16>, vector<256x512xbf16>, vector<2x512xf32> -> vector<2x512xf32>
    %c0_51 = arith.constant 0 : index
    %c0_52 = arith.constant 0 : index
    %76 = vector.load %arg18[%c0_51, %c0_52] : memref<1x512xf32, #tpu.memory_space<vmem>>, vector<1x512xf32>
    %77 = vector.broadcast %76 : vector<1x512xf32> to vector<2x512xf32>
    %78 = arith.addf %75, %77 : vector<2x512xf32>
    %cst_53 = arith.constant 0.000000e+00 : f32
    %79 = vector.broadcast %cst_53 : f32 to vector<2x512xf32>
    %80 = arith.maximumf %78, %79 : vector<2x512xf32>
    %81 = arith.truncf %80 : vector<2x512xf32> to vector<2x512xbf16>
    %c0_54 = arith.constant 0 : index
    %c0_55 = arith.constant 0 : index
    %82 = vector.load %arg19[%c0_54, %c0_55] : memref<512x256xbf16, #tpu.memory_space<vmem>>, vector<512x256xbf16>
    %cst_56 = arith.constant dense<0.000000e+00> : vector<2x256xf32>
    %83 = tpu.matmul %81, %82, %cst_56 {dimension_numbers = #tpu.dot_dimension_numbers<[1], [0], [0], [1], [0, 0, 1, 1], [], []>} : vector<2x512xbf16>, vector<512x256xbf16>, vector<2x256xf32> -> vector<2x256xf32>
    %c0_57 = arith.constant 0 : index
    %c0_58 = arith.constant 0 : index
    %84 = vector.load %arg20[%c0_57, %c0_58] : memref<1x256xf32, #tpu.memory_space<vmem>>, vector<1x256xf32>
    %85 = vector.broadcast %84 : vector<1x256xf32> to vector<2x256xf32>
    %86 = arith.addf %83, %85 : vector<2x256xf32>
    %cst_59 = arith.constant 0.000000e+00 : f32
    %87 = vector.broadcast %cst_59 : f32 to vector<2x256xf32>
    %88 = arith.subf %87, %86 : vector<2x256xf32>
    %89 = math.exp %88 : vector<2x256xf32>
    %cst_60 = arith.constant 1.000000e+00 : f32
    %90 = vector.broadcast %cst_60 : f32 to vector<2x256xf32>
    %91 = arith.addf %90, %89 : vector<2x256xf32>
    %cst_61 = arith.constant 1.000000e+00 : f32
    %92 = vector.broadcast %cst_61 : f32 to vector<2x256xf32>
    %93 = arith.divf %92, %91 : vector<2x256xf32>
    %c0_62 = arith.constant 0 : index
    %c0_63 = arith.constant 0 : index
    %94 = vector.load %arg21[%c0_62, %c0_63] : memref<2x256xf32, #tpu.memory_space<vmem>>, vector<2x256xf32>
    tpu.vector_store %arg21[%c0_62, %c0_63], %93 {strides = array<i32>} : memref<2x256xf32, #tpu.memory_space<vmem>>, vector<2x256xf32>,
    %c0_64 = arith.constant 0 : index
    %c0_65 = arith.constant 0 : index
    %95 = vector.load %arg22[%c0_64, %c0_65] : memref<2x8xf32, #tpu.memory_space<vmem>>, vector<2x8xf32>
    tpu.vector_store %arg22[%c0_64, %c0_65], %38 {strides = array<i32>} : memref<2x8xf32, #tpu.memory_space<vmem>>, vector<2x8xf32>,
    %cst_66 = arith.constant 0.000000e+00 : f32
    %96 = vector.broadcast %cst_66 : f32 to vector<2x8xf32>
    %97 = arith.maximumf %39, %96 : vector<2x8xf32>
    %98 = math.absf %39 : vector<2x8xf32>
    %cst_67 = arith.constant 0.000000e+00 : f32
    %99 = vector.broadcast %cst_67 : f32 to vector<2x8xf32>
    %100 = arith.subf %99, %98 : vector<2x8xf32>
    %101 = math.exp %100 : vector<2x8xf32>
    %cst_68 = arith.constant 1.000000e+00 : f32
    %102 = vector.broadcast %cst_68 : f32 to vector<2x8xf32>
    %103 = arith.addf %102, %101 : vector<2x8xf32>
    %104 = math.log %103 : vector<2x8xf32>
    %105 = arith.addf %97, %104 : vector<2x8xf32>
    %c0_69 = arith.constant 0 : index
    %c0_70 = arith.constant 0 : index
    %106 = vector.load %arg23[%c0_69, %c0_70] : memref<2x8xf32, #tpu.memory_space<vmem>>, vector<2x8xf32>
    tpu.vector_store %arg23[%c0_69, %c0_70], %105 {strides = array<i32>} : memref<2x8xf32, #tpu.memory_space<vmem>>, vector<2x8xf32>,
    return
  }
  func.func @transform_0(%arg0: i32) -> (i32, i32) {
    %c0_i32 = arith.constant 0 : i32
    %c0_i32_0 = arith.constant 0 : i32
    %c0_i32_1 = arith.constant 0 : i32
    return %c0_i32, %c0_i32_0 : i32, i32
  }
  func.func @transform_1(%arg0: i32) -> (i32, i32) {
    %c0_i32 = arith.constant 0 : i32
    %c0_i32_0 = arith.constant 0 : i32
    %c0_i32_1 = arith.constant 0 : i32
    return %c0_i32, %c0_i32_0 : i32, i32
  }
  func.func @transform_2(%arg0: i32) -> (i32, i32) {
    %c0_i32 = arith.constant 0 : i32
    %c0_i32_0 = arith.constant 0 : i32
    %c0_i32_1 = arith.constant 0 : i32
    return %c0_i32, %c0_i32_0 : i32, i32
  }
  func.func @transform_3(%arg0: i32) -> (i32, i32) {
    %c0_i32 = arith.constant 0 : i32
    %c0_i32_0 = arith.constant 0 : i32
    %c0_i32_1 = arith.constant 0 : i32
    return %c0_i32, %c0_i32_0 : i32, i32
  }
  func.func @transform_4(%arg0: i32) -> (i32, i32) {
    %c0_i32 = arith.constant 0 : i32
    %c0_i32_0 = arith.constant 0 : i32
    %c0_i32_1 = arith.constant 0 : i32
    return %c0_i32, %c0_i32_0 : i32, i32
  }
  func.func @transform_5(%arg0: i32) -> (i32, i32) {
    %c0_i32 = arith.constant 0 : i32
    %c0_i32_0 = arith.constant 0 : i32
    %c0_i32_1 = arith.constant 0 : i32
    return %c0_i32, %c0_i32_0 : i32, i32
  }
  func.func @transform_6(%arg0: i32) -> (i32, i32) {
    %c0_i32 = arith.constant 0 : i32
    %c0_i32_0 = arith.constant 0 : i32
    %c0_i32_1 = arith.constant 0 : i32
    return %c0_i32, %c0_i32_0 : i32, i32
  }
  func.func @transform_7(%arg0: i32) -> (i32, i32) {
    %c0_i32 = arith.constant 0 : i32
    %c0_i32_0 = arith.constant 0 : i32
    %c0_i32_1 = arith.constant 0 : i32
    return %c0_i32, %c0_i32_0 : i32, i32
  }
  func.func @transform_8(%arg0: i32) -> (i32, i32) {
    %c0_i32 = arith.constant 0 : i32
    %c0_i32_0 = arith.constant 0 : i32
    %c0_i32_1 = arith.constant 0 : i32
    return %c0_i32, %c0_i32_0 : i32, i32
  }
  func.func @transform_9(%arg0: i32) -> (i32, i32) {
    %c0_i32 = arith.constant 0 : i32
    %c0_i32_0 = arith.constant 0 : i32
    %c0_i32_1 = arith.constant 0 : i32
    return %c0_i32, %c0_i32_0 : i32, i32
  }
  func.func @transform_10(%arg0: i32) -> (i32, i32) {
    %c0_i32 = arith.constant 0 : i32
    %c0_i32_0 = arith.constant 0 : i32
    %c0_i32_1 = arith.constant 0 : i32
    return %c0_i32, %c0_i32_0 : i32, i32
  }
  func.func @transform_11(%arg0: i32) -> (i32, i32) {
    %c0_i32 = arith.constant 0 : i32
    %c0_i32_0 = arith.constant 0 : i32
    %c0_i32_1 = arith.constant 0 : i32
    return %c0_i32, %c0_i32_0 : i32, i32
  }
  func.func @transform_12(%arg0: i32) -> (i32, i32) {
    %c0_i32 = arith.constant 0 : i32
    %c0_i32_0 = arith.constant 0 : i32
    %c0_i32_1 = arith.constant 0 : i32
    return %c0_i32, %c0_i32_0 : i32, i32
  }
  func.func @transform_13(%arg0: i32) -> (i32, i32) {
    %c0_i32 = arith.constant 0 : i32
    %c0_i32_0 = arith.constant 0 : i32
    %c0_i32_1 = arith.constant 0 : i32
    return %c0_i32, %c0_i32_0 : i32, i32
  }
  func.func @transform_14(%arg0: i32) -> (i32, i32) {
    %c0_i32 = arith.constant 0 : i32
    %c0_i32_0 = arith.constant 0 : i32
    %c0_i32_1 = arith.constant 0 : i32
    return %c0_i32, %c0_i32_0 : i32, i32
  }
  func.func @transform_15(%arg0: i32) -> (i32, i32) {
    %c0_i32 = arith.constant 0 : i32
    %c0_i32_0 = arith.constant 0 : i32
    %c0_i32_1 = arith.constant 0 : i32
    return %c0_i32, %c0_i32_0 : i32, i32
  }
  func.func @transform_16(%arg0: i32) -> (i32, i32) {
    %c0_i32 = arith.constant 0 : i32
    %c0_i32_0 = arith.constant 0 : i32
    %c0_i32_1 = arith.constant 0 : i32
    return %c0_i32, %c0_i32_0 : i32, i32
  }
  func.func @transform_17(%arg0: i32) -> (i32, i32) {
    %c0_i32 = arith.constant 0 : i32
    %c0_i32_0 = arith.constant 0 : i32
    %c0_i32_1 = arith.constant 0 : i32
    return %c0_i32, %c0_i32_0 : i32, i32
  }
  func.func @transform_18(%arg0: i32) -> (i32, i32) {
    %c0_i32 = arith.constant 0 : i32
    %c0_i32_0 = arith.constant 0 : i32
    %c0_i32_1 = arith.constant 0 : i32
    return %c0_i32, %c0_i32_0 : i32, i32
  }
  func.func @transform_19(%arg0: i32) -> (i32, i32) {
    %c0_i32 = arith.constant 0 : i32
    %c0_i32_0 = arith.constant 0 : i32
    %c0_i32_1 = arith.constant 0 : i32
    return %c0_i32, %c0_i32_0 : i32, i32
  }
  func.func @transform_20(%arg0: i32) -> (i32, i32) {
    %c0_i32 = arith.constant 0 : i32
    %c0_i32_0 = arith.constant 0 : i32
    %c0_i32_1 = arith.constant 0 : i32
    return %c0_i32, %c0_i32_0 : i32, i32
  }
  func.func @transform_21(%arg0: i32) -> (i32, i32) {
    %c0_i32 = arith.constant 0 : i32
    %c0_i32_0 = arith.constant 0 : i32
    %c0_i32_1 = arith.constant 0 : i32
    return %c0_i32, %c0_i32_0 : i32, i32
  }
  func.func @transform_22(%arg0: i32) -> (i32, i32) {
    %c0_i32 = arith.constant 0 : i32
    %c0_i32_0 = arith.constant 0 : i32
    %c0_i32_1 = arith.constant 0 : i32
    return %c0_i32, %c0_i32_0 : i32, i32
  }
}

</mosaic_0001>

<bundles_post_ra>
// kernel: model_forward.1
= control target key start
LH: loop header
LB: loop body
LE: loop exit
PB: predicated region body
PF: predicated region fallthrough
CT: control target
= control target key end

     0   :  { %s3957_s0 = inlined_call_operand.vmem [shape: bf16[2,256], index: 0, kind: input, shape index: {}]   ;;  %s3958_s1 = inlined_call_operand.vmem [shape: f32[2,8], index: 1, kind: input, shape index: {}]   ;;  %s3959_s2 = inlined_call_operand.hbm [shape: bf16[256,512], index: 2, kind: input, shape index: {}]   ;;  %s3960_s3 = inlined_call_operand.vmem [shape: f32[1,512], index: 3, kind: input, shape index: {}]   ;;  %s3961_s4 = inlined_call_operand.hbm [shape: bf16[512,256], index: 4, kind: input, shape index: {}]   ;;  %s3962_s5 = inlined_call_operand.vmem [shape: f32[1,256], index: 5, kind: input, shape index: {}]   ;;  %s3963_s6 = inlined_call_operand.vmem [shape: bf16[256,64], index: 6, kind: input, shape index: {}]   ;;  %s3964_s7 = inlined_call_operand.vmem [shape: f32[1,64], index: 7, kind: input, shape index: {}]   ;;  %s3965_s8 = inlined_call_operand.vmem [shape: bf16[64,32], index: 8, kind: input, shape index: {}]   ;;  %s3966_s9 = inlined_call_operand.vmem [shape: f32[1,32], index: 9, kind: input, shape index: {}]   ;;  %s3967_s10 = inlined_call_operand.vmem [shape: bf16[32,256], index: 10, kind: input, shape index: {}]   ;;  %s3968_s11 = inlined_call_operand.vmem [shape: f32[1,256], index: 11, kind: input, shape index: {}]   ;;  %s3969_s12 = inlined_call_operand.vmem [shape: bf16[8,64], index: 12, kind: input, shape index: {}]   ;;  %s3970_s13 = inlined_call_operand.vmem [shape: f32[1,64], index: 13, kind: input, shape index: {}]   ;;  %s3971_s14 = inlined_call_operand.vmem [shape: bf16[64,256], index: 14, kind: input, shape index: {}]   ;;  %s3972_s15 = inlined_call_operand.vmem [shape: f32[1,256], index: 15, kind: input, shape index: {}]   ;;  %s3973_s16 = inlined_call_operand.hbm [shape: bf16[256,512], index: 16, kind: input, shape index: {}]   ;;  %s3974_s17 = inlined_call_operand.vmem [shape: f32[1,512], index: 17, kind: input, shape index: {}]   ;;  %s3975_s18 = inlined_call_operand.hbm [shape: bf16[512,256], index: 18, kind: input, shape index: {}]   ;;  %s3976_s19 = inlined_call_operand.vmem [shape: f32[1,256], index: 19, kind: input, shape index: {}]   ;;  %s3977_s20 = inlined_call_operand.vmem [shape: f32[2,256], index: 20, kind: output, shape index: {0}]   ;;  %s3978_s21 = inlined_call_operand.hbm [shape: f32[2,8], index: 21, kind: output, shape index: {1}]   ;;  %s3979_s22 = inlined_call_operand.hbm [shape: f32[2,8], index: 22, kind: output, shape index: {2}]  }
   0x1   :  { %3981 = sst [smem:[#allocation18_spill]] %s3957_s0 }
   0x2   :  { %3982 = sst [smem:[#allocation19_spill]] %s3958_s1 }
   0x3   :  { %3983 = sst [smem:[#allocation20_spill]] %s3959_s2 }
   0x4   :  { %3984 = sst [smem:[#allocation21_spill]] %s3960_s3 }
   0x5   :  { %3985 = sst [smem:[#allocation22_spill]] %s3961_s4 }
   0x6   :  { %3986 = sst [smem:[#allocation23_spill]] %s3962_s5 }
   0x7   :  { %3987 = sst [smem:[#allocation24_spill]] %s3963_s6 }
   0x8   :  { %3988 = sst [smem:[#allocation25_spill]] %s3977_s20 }
   0x9   :  { %28 = vsyncpa [#allocation3], 0 }
   0xa   :  { %29 = vsyncpa [#allocation6], 0 }
   0xb   :  { %30 = vsyncpa [#allocation9], 0 }
   0xc   :  { %31 = vsyncpa [#allocation4], 0 }
   0xd   :  { %32 = vsyncpa [#allocation12], 0  ;;  %s3625_s3 = smov [#allocation5]  }
   0xe   :  { %s56_s28 = sshll.u32 %s3625_s3, 4  ;;  %s57_s28 = int_to_ptr.vmem [resolvable:$true] %s56_s28 }
   0xf   :  { %s3503_s29 = scalar_lea.vmem %s57_s28, 8192  ;;  %p3508_p1 = scmp.lt.s32.totalorder %s57_s28, %s57_s28 }
  0x10   :  { %p3504_p0 = scmp.ne.s32.totalorder %s57_s28, %s3503_s29  ;;  %p3509_p2 = scmp.lt.s32.totalorder %s3503_s29, %s3503_s29 }
  0x12   :  { %p3510_p3 = por %p3509_p2, %p3508_p1 }
  0x14   :  { %p3511_p4 = pnand %p3510_p3, %p3504_p0 }
  0x16   :  { %3514 = shalt.err (!%p3511_p4)
}
  0x17   :  { %s3626_s30 = smov 128   ;;  %s3627_s4 = smov 8  }
  0x18   :  { %s3989_s1 = sld [smem:[#allocation22_spill]]  ;;  %s3628_s5 = smov [#allocation2]  }
  0x19   :  { %s42_s24 = sshll.u32 %s3628_s5, 4  ;;  %s43_s24 = int_to_ptr.vmem [resolvable:$true] %s42_s24 }
  0x1a   :  { %s3523_s6 = scalar_lea.vmem %s43_s24, 8192  ;;  %p3528_p6 = scmp.lt.s32.totalorder %s43_s24, %s43_s24 }
  0x1b   :  { %p3524_p5 = scmp.ne.s32.totalorder %s43_s24, %s3523_s6  ;;  %p3529_p7 = scmp.lt.s32.totalorder %s3523_s6, %s3523_s6 }
  0x1d   :  { %p3530_p8 = por %p3529_p7, %p3528_p6 }
  0x1e   :  { %62 = dma.hbm_to_vmem [thread:$0]  %s3989_s1, 8192, %s57_s28, [#allocation6], %s3626_s30, %s3626_s30, %s3627_s4  }
  0x1f   :  { %p3531_p9 = pnand %p3530_p8, %p3524_p5 }
  0x21   :  { %3534 = shalt.err (!%p3531_p9)
}
  0x22   :  { %s3629_s25 = smov 256   ;;  %s3630_s26 = smov 16  }
  0x23   :  { %s3990_s3 = sld [smem:[#allocation20_spill]]  ;;  %s3631_s29 = smov [#allocation7]  }
  0x24   :  { %s90_s20 = sshll.u32 %s3631_s29, 4  ;;  %s3632_s0 = smov [#allocation8]   ;;  %s91_s20 = int_to_ptr.vmem [resolvable:$true] %s90_s20 }
  0x25   :  { %s104_s28 = sshll.u32 %s3632_s0, 4  ;;  %s3543_s23 = scalar_lea.vmem %s91_s20, 8192  ;;  %s105_s28 = int_to_ptr.vmem [resolvable:$true] %s104_s28 }
  0x26   :  { %p3544_p10 = scmp.ne.s32.totalorder %s91_s20, %s3543_s23  ;;  %p3548_p11 = scmp.lt.s32.totalorder %s91_s20, %s91_s20 }
  0x27   :  { %p3549_p12 = scmp.lt.s32.totalorder %s3543_s23, %s3543_s23 }
  0x29   :  { %48 = dma.hbm_to_vmem [thread:$0]  %s3990_s3, 8192, %s43_s24, [#allocation3], %s3629_s25, %s3629_s25, %s3630_s26  }
  0x2a   :  { %p3550_p13 = por %p3549_p12, %p3548_p11 }
  0x2c   :  { %p3551_p0 = pnand %p3550_p13, %p3544_p10 }
  0x2e   :  { %3554 = shalt.err (!%p3551_p0)
}
  0x2f   :  { %96 = dma.hbm_to_vmem [thread:$0]  %s3973_s16, 8192, %s91_s20, [#allocation6], %s3629_s25, %s3629_s25, %s3630_s26  }
  0x30   :  { %s3563_s6 = scalar_lea.vmem %s105_s28, 8192  ;;  %p3568_p2 = scmp.lt.s32.totalorder %s105_s28, %s105_s28 }
  0x31   :  { %p3564_p1 = scmp.ne.s32.totalorder %s105_s28, %s3563_s6  ;;  %p3569_p3 = scmp.lt.s32.totalorder %s3563_s6, %s3563_s6 }
  0x33   :  { %p3570_p4 = por %p3569_p3, %p3568_p2 }
  0x35   :  { %p3571_p5 = pnand %p3570_p4, %p3564_p1 }
  0x37   :  { %3574 = shalt.err (!%p3571_p5)
}
  0x38   :  { %110 = dma.hbm_to_vmem [thread:$0]  %s3975_s18, 8192, %s105_s28, [#allocation9], %s3626_s30, %s3626_s30, %s3627_s4  }
  0x39   :  { %3615 = dma.done.wait [#allocation3], 8192  }
  0x3a   :  { %3616 = vsyncadd [#allocation3], 4294959104 }
  0x3b   :  { %3617 = dma.done.wait [#allocation6], 16384  }
  0x3c   :  { %3618 = vsyncadd [#allocation6], 4294950912 }
  0x3d   :  { %3619 = dma.done.wait [#allocation9], 8192  }
  0x3e   :  { %3620 = vsyncadd [#allocation9], 4294959104  ;;  %v3057_v0 = vld [vmem:[#allocation2 + $0xe4] ss:$16 sps:$4 sm:$0xff]   ;;  %v3059_v1 = vld [vmem:[#allocation2 + $0xec] ss:$16 sps:$4 sm:$0xff]   ;;  %v193_v38 = vlaneseq }
  0x3f   :  { %558 = vmatprep.subr.bf16.mxu0 %v3057_v0  ;;  %v3061_v2 = vld [vmem:[#allocation2 + $0xe0] ss:$16 sps:$4 sm:$0xff]   ;;  %v3062_v3 = vld [vmem:[#allocation2 + $0xe8] ss:$16 sps:$4 sm:$0xff]   ;;  %599 = vmatprep.subr.bf16.mxu1 %v3059_v1  ;;  %v3063_v4 = vld [vmem:[#allocation2 + $0xc4] ss:$16 sps:$4 sm:$0xff]  }
  0x40   :  { %559 = vmatpush1.bf16.msra.mxu0 %v3061_v2  ;;  %600 = vmatpush1.bf16.msra.mxu1 %v3062_v3  ;;  %v3065_v5 = vld [vmem:[#allocation2 + $0xcc] ss:$16 sps:$4 sm:$0xff]   ;;  %v3067_v6 = vld [vmem:[#allocation2 + $0xc0] ss:$16 sps:$4 sm:$0xff]   ;;  %v3068_v7 = vld [vmem:[#allocation2 + $0xc8] ss:$16 sps:$4 sm:$0xff]  }
  0x41   :  { %560 = vmatprep.subr.bf16.mxu0 %v3063_v4  ;;  %601 = vmatprep.subr.bf16.mxu1 %v3065_v5  ;;  %v3069_v8 = vld [vmem:[#allocation2 + $0xa4] ss:$16 sps:$4 sm:$0xff]   ;;  %v3071_v9 = vld [vmem:[#allocation2 + $0xac] ss:$16 sps:$4 sm:$0xff]   ;;  %v3073_v10 = vld [vmem:[#allocation2 + $0xa0] ss:$16 sps:$4 sm:$0xff]  }
  0x42   :  { %v3074_v11 = vld [vmem:[#allocation2 + $0xa8] ss:$16 sps:$4 sm:$0xff]   ;;  %v3075_v12 = vld [vmem:[#allocation2 + $0x84] ss:$16 sps:$4 sm:$0xff]   ;;  %v3077_v13 = vld [vmem:[#allocation2 + $0x8c] ss:$16 sps:$4 sm:$0xff]  }
  0x43   :  { %v3079_v14 = vld [vmem:[#allocation2 + $0x80] ss:$16 sps:$4 sm:$0xff]   ;;  %v3080_v15 = vld [vmem:[#allocation2 + $0x88] ss:$16 sps:$4 sm:$0xff]   ;;  %v3081_v16 = vld [vmem:[#allocation2 + $0x64] ss:$16 sps:$4 sm:$0xff]  }
  0x44   :  { %561 = vmatpush1.bf16.msra.mxu0 %v3067_v6  ;;  %602 = vmatpush1.bf16.msra.mxu1 %v3068_v7  ;;  %v3083_v17 = vld [vmem:[#allocation2 + $0x6c] ss:$16 sps:$4 sm:$0xff]   ;;  %v3085_v18 = vld [vmem:[#allocation2 + $0x60] ss:$16 sps:$4 sm:$0xff]   ;;  %v3086_v19 = vld [vmem:[#allocation2 + $0x68] ss:$16 sps:$4 sm:$0xff]  }
  0x45   :  { %562 = vmatprep.subr.bf16.mxu0 %v3069_v8  ;;  %603 = vmatprep.subr.bf16.mxu1 %v3071_v9  ;;  %v3087_v20 = vld [vmem:[#allocation2 + $0x44] ss:$16 sps:$4 sm:$0xff]   ;;  %v3089_v21 = vld [vmem:[#allocation2 + $0x4c] ss:$16 sps:$4 sm:$0xff]   ;;  %v3091_v22 = vld [vmem:[#allocation2 + $0x40] ss:$16 sps:$4 sm:$0xff]  }
  0x46   :  { %v3092_v23 = vld [vmem:[#allocation2 + $0x48] ss:$16 sps:$4 sm:$0xff]   ;;  %v3093_v24 = vld [vmem:[#allocation2 + $0x24] ss:$16 sps:$4 sm:$0xff]   ;;  %v3095_v25 = vld [vmem:[#allocation2 + $0x2c] ss:$16 sps:$4 sm:$0xff]  }
  0x47   :  { %v3097_v26 = vld [vmem:[#allocation2 + $0x20] ss:$16 sps:$4 sm:$0xff]   ;;  %v3098_v27 = vld [vmem:[#allocation2 + $0x28] ss:$16 sps:$4 sm:$0xff]   ;;  %v3099_v28 = vld [vmem:[#allocation2 + $0x4] ss:$16 sps:$4 sm:$0xff]  }
  0x48   :  { %563 = vmatpush1.bf16.msra.mxu0 %v3073_v10  ;;  %604 = vmatpush1.bf16.msra.mxu1 %v3074_v11  ;;  %v3101_v29 = vld [vmem:[#allocation2 + $0xc] ss:$16 sps:$4 sm:$0xff]   ;;  %v3103_v30 = vld [vmem:[#allocation2] ss:$16 sps:$4 sm:$0xff]   ;;  %v3104_v31 = vld [vmem:[#allocation2 + $0x8] ss:$16 sps:$4 sm:$0xff]  }
  0x49   :  { %564 = vmatprep.subr.bf16.mxu0 %v3075_v12  ;;  %605 = vmatprep.subr.bf16.mxu1 %v3077_v13  ;;  %v3105_v32 = vld [vmem:[#allocation2 + $0x1e4] ss:$16 sps:$4 sm:$0xff]   ;;  %v3107_v33 = vld [vmem:[#allocation2 + $0x1ec] ss:$16 sps:$4 sm:$0xff]   ;;  %v3109_v34 = vld [vmem:[#allocation2 + $0x1e0] ss:$16 sps:$4 sm:$0xff]  }
  0x4a   :  { %v3110_v35 = vld [vmem:[#allocation2 + $0x1e8] ss:$16 sps:$4 sm:$0xff]   ;;  %v3111_v36 = vld [vmem:[#allocation2 + $0x1c4] ss:$16 sps:$4 sm:$0xff]   ;;  %v3113_v37 = vld [vmem:[#allocation2 + $0x1cc] ss:$16 sps:$4 sm:$0xff]  }
  0x4b   :  { %v3633_v39 = vmov 1966171168   ;;  %v3115_v41 = vld [vmem:[#allocation2 + $0x1c0] ss:$16 sps:$4 sm:$0xff]   ;;  %v3116_v42 = vld [vmem:[#allocation2 + $0x1c8] ss:$16 sps:$4 sm:$0xff]  }
  0x4c   :  { %565 = vmatpush1.bf16.msra.mxu0 %v3079_v14  ;;  %606 = vmatpush1.bf16.msra.mxu1 %v3080_v15  ;;  %v223_v40 = vunpack.c.l.s4 %v3633_v39  ;;  %v3117_v43 = vld [vmem:[#allocation2 + $0x1a4] ss:$16 sps:$4 sm:$0xff]   ;;  %v3119_v44 = vld [vmem:[#allocation2 + $0x1ac] ss:$16 sps:$4 sm:$0xff]   ;;  %v3772_v45 = vshrl.u32 %v193_v38, 7  ;;  %s3991_s20 = sld [smem:[#allocation18_spill]] }
  0x4d   :  { %566 = vmatprep.subr.bf16.mxu0 %v3081_v16  ;;  %607 = vmatprep.subr.bf16.mxu1 %v3083_v17  ;;  %v3121_v47 = vld [vmem:[#allocation2 + $0x1a0] ss:$16 sps:$4 sm:$0xff]   ;;  %v3122_v48 = vld [vmem:[#allocation2 + $0x1a8] ss:$16 sps:$4 sm:$0xff]   ;;  %v3123_v49 = vld [vmem:[#allocation2 + $0x184] ss:$16 sps:$4 sm:$0xff]  }
  0x4e   :  { %v224_v46 = vunpack.c.0.s8 %v223_v40  ;;  %v3125_v50 = vld [vmem:[#allocation2 + $0x18c] ss:$16 sps:$4 sm:$0xff]   ;;  %v3127_v53 = vld [vmem:[#allocation2 + $0x180] ss:$16 sps:$4 sm:$0xff]   ;;  %v3128_v54 = vld [vmem:[#allocation2 + $0x188] ss:$16 sps:$4 sm:$0xff]  }
  0x4f   :  { %v3129_v56 = vld [vmem:[#allocation2 + $0x164] ss:$16 sps:$4 sm:$0xff]   ;;  %v3131_v57 = vld [vmem:[#allocation2 + $0x16c] ss:$16 sps:$4 sm:$0xff]   ;;  %v3133_v59 = vld [vmem:[#allocation2 + $0x160] ss:$16 sps:$4 sm:$0xff]  }
  0x50   :  { %567 = vmatpush1.bf16.msra.mxu0 %v3085_v18  ;;  %608 = vmatpush1.bf16.msra.mxu1 %v3086_v19  ;;  %v227_v51 = vsub.s32 %v224_v46, %v3772_v45  ;;  %v3134_v60 = vld [vmem:[#allocation2 + $0x168] ss:$16 sps:$4 sm:$0xff]   ;;  %v3135_v61 = vld [vmem:[#allocation2 + $0x144] ss:$16 sps:$4 sm:$0xff]   ;;  %v3137_v62 = vld [vmem:[#allocation2 + $0x14c] ss:$16 sps:$4 sm:$0xff]  }
  0x51   :  { %568 = vmatprep.subr.bf16.mxu0 %v3087_v20  ;;  %609 = vmatprep.subr.bf16.mxu1 %v3089_v21  ;;  %v3139_v63 = vld [vmem:[#allocation2 + $0x140] ss:$16 sps:$4 sm:$0xff]   ;;  %v3140_v0 = vld [vmem:[#allocation2 + $0x148] ss:$16 sps:$4 sm:$0xff]   ;;  %v3141_v1 = vld [vmem:[#allocation2 + $0x124] ss:$16 sps:$4 sm:$0xff]  }
  0x52   :  { %v2699_v52 = vld.sshfl [vmem:[%s3991_s20] sm:$0x11 pattern:$0x75316420]  ;;  %v3143_v2 = vld [vmem:[#allocation2 + $0x12c] ss:$16 sps:$4 sm:$0xff]  }
  0x53   :  { %v221_v55 = vcombine.high %v2699_v52, %v2699_v52  ;;  %v3145_v3 = vld [vmem:[#allocation2 + $0x120] ss:$16 sps:$4 sm:$0xff]   ;;  %v3146_v4 = vld [vmem:[#allocation2 + $0x128] ss:$16 sps:$4 sm:$0xff]   ;;  %v3147_v5 = vld [vmem:[#allocation2 + $0x104] ss:$16 sps:$4 sm:$0xff]   ;;  %v228_v11 = vrot.slane %v2699_v52, %v227_v51 }
  0x54   :  { %569 = vmatpush1.bf16.msra.mxu0 %v3091_v22  ;;  %610 = vmatpush1.bf16.msra.mxu1 %v3092_v23  ;;  %v3149_v6 = vld [vmem:[#allocation2 + $0x10c] ss:$16 sps:$4 sm:$0xff]   ;;  %v3151_v7 = vld [vmem:[#allocation2 + $0x100] ss:$16 sps:$4 sm:$0xff]   ;;  %v3152_v8 = vld [vmem:[#allocation2 + $0x108] ss:$16 sps:$4 sm:$0xff]  }
  0x55   :  { %570 = vmatprep.subr.bf16.mxu0 %v3093_v24  ;;  %611 = vmatprep.subr.bf16.mxu1 %v3095_v25  ;;  %v235_v58 = vrot.slane %v221_v55, %v227_v51  ;;  %v3155_v9 = vld [vmem:[#allocation5 + $0x74] ss:$8 sps:$4 sm:$0xff]   ;;  %v3153_v12 = vld [vmem:[#allocation5 + $0x70] ss:$8 sps:$4 sm:$0xff]   ;;  %v3161_v14 = vld [vmem:[#allocation5 + $0x64] ss:$8 sps:$4 sm:$0xff]  }
  0x56   :  { %v3158_v10 = vld [vmem:[#allocation5 + $0x174] ss:$8 sps:$4 sm:$0xff]   ;;  %v3156_v13 = vld [vmem:[#allocation5 + $0x170] ss:$8 sps:$4 sm:$0xff]   ;;  %v3164_v15 = vld [vmem:[#allocation5 + $0x164] ss:$8 sps:$4 sm:$0xff]  }
  0x57   :  { %590 = vmatprep.mubr.bf16.mxu0 %v235_v58  ;;  %631 = vmatprep.mubr.bf16.mxu1 %v235_v58  ;;  %v3159_v16 = vld [vmem:[#allocation5 + $0x60] ss:$8 sps:$4 sm:$0xff]   ;;  %v3167_v18 = vld [vmem:[#allocation5 + $0x54] ss:$8 sps:$4 sm:$0xff]   ;;  %v3165_v20 = vld [vmem:[#allocation5 + $0x50] ss:$8 sps:$4 sm:$0xff]  }
  0x58   :  { %571 = vmatpush1.bf16.msra.mxu0 %v3097_v26  ;;  %612 = vmatpush1.bf16.msra.mxu1 %v3098_v27  ;;  %v3162_v17 = vld [vmem:[#allocation5 + $0x160] ss:$8 sps:$4 sm:$0xff]   ;;  %v3170_v19 = vld [vmem:[#allocation5 + $0x154] ss:$8 sps:$4 sm:$0xff]   ;;  %v3168_v21 = vld [vmem:[#allocation5 + $0x150] ss:$8 sps:$4 sm:$0xff]  }
  0x59   :  { %572 = vmatprep.subr.bf16.mxu0 %v3099_v28  ;;  %613 = vmatprep.subr.bf16.mxu1 %v3101_v29  ;;  %v3173_v22 = vld [vmem:[#allocation5 + $0x44] ss:$8 sps:$4 sm:$0xff]   ;;  %v3171_v24 = vld [vmem:[#allocation5 + $0x40] ss:$8 sps:$4 sm:$0xff]   ;;  %v3179_v26 = vld [vmem:[#allocation5 + $0x34] ss:$8 sps:$4 sm:$0xff]  }
  0x5a   :  { %v3176_v23 = vld [vmem:[#allocation5 + $0x144] ss:$8 sps:$4 sm:$0xff]   ;;  %v3174_v25 = vld [vmem:[#allocation5 + $0x140] ss:$8 sps:$4 sm:$0xff]   ;;  %v3182_v27 = vld [vmem:[#allocation5 + $0x134] ss:$8 sps:$4 sm:$0xff]  }
  0x5b   :  { %v3177_v28 = vld [vmem:[#allocation5 + $0x30] ss:$8 sps:$4 sm:$0xff]   ;;  %v3197_v38 = vld [vmem:[#allocation5 + $0x4] ss:$8 sps:$4 sm:$0xff]   ;;  %v3195_v40 = vld [vmem:[#allocation5] ss:$8 sps:$4 sm:$0xff]  }
  0x5c   :  { %573 = vmatpush1.bf16.msra.mxu0 %v3103_v30  ;;  %614 = vmatpush1.bf16.msra.mxu1 %v3104_v31  ;;  %v3180_v29 = vld [vmem:[#allocation5 + $0x130] ss:$8 sps:$4 sm:$0xff]   ;;  %v3185_v30 = vld [vmem:[#allocation5 + $0x24] ss:$8 sps:$4 sm:$0xff]   ;;  %v3215_v51 = vld [vmem:[#allocation5 + $0xd4] ss:$8 sps:$4 sm:$0xff]  }
  0x5d   :  { %574 = vmatprep.subr.bf16.mxu0 %v3105_v32  ;;  %615 = vmatprep.subr.bf16.mxu1 %v3107_v33  ;;  %v3188_v31 = vld [vmem:[#allocation5 + $0x124] ss:$8 sps:$4 sm:$0xff]   ;;  %v3183_v32 = vld [vmem:[#allocation5 + $0x20] ss:$8 sps:$4 sm:$0xff]   ;;  %v3204_v46 = vld [vmem:[#allocation5 + $0x1f0] ss:$8 sps:$4 sm:$0xff]  }
  0x5e   :  { %v3186_v33 = vld [vmem:[#allocation5 + $0x120] ss:$8 sps:$4 sm:$0xff]   ;;  %v3200_v39 = vld [vmem:[#allocation5 + $0x104] ss:$8 sps:$4 sm:$0xff]   ;;  %v3218_v52 = vld [vmem:[#allocation5 + $0x1d4] ss:$8 sps:$4 sm:$0xff]  }
  0x5f   :  { %v3221_v55 = vld [vmem:[#allocation5 + $0xc4] ss:$8 sps:$4 sm:$0xff]   ;;  %v3222_v58 = vld [vmem:[#allocation5 + $0x1c0] ss:$8 sps:$4 sm:$0xff]   ;;  %s3992_s25 = sld [smem:[#allocation24_spill]]  ;;  %vm3635_vm0 = vmmov 0  }
  0x60   :  { %575 = vmatpush2.bf16.msra.mxu0 %v3109_v34  ;;  %616 = vmatpush2.bf16.msra.mxu1 %v3110_v35  ;;  %v3191_v34 = vld [vmem:[#allocation5 + $0x14] ss:$8 sps:$4 sm:$0xff]   ;;  %s3993_s3 = sld [smem:[#allocation21_spill]]  ;;  %vm1346_vm1 = vcmask 523264   ;;  %vm1428_vm2 = vcmask 261120   ;;  %vm1500_vm3 = vcmask 1043456  }
  0x61   :  { %576 = vmatprep.subr.bf16.mxu0 %v3111_v36  ;;  %617 = vmatprep.subr.bf16.mxu1 %v3113_v37  ;;  %v3194_v35 = vld [vmem:[#allocation5 + $0x114] ss:$8 sps:$4 sm:$0xff]   ;;  %v3189_v36 = vld [vmem:[#allocation5 + $0x10] ss:$8 sps:$4 sm:$0xff]   ;;  %s3994_s29 = sld [smem:[#allocation23_spill]]  ;;  %vm2652_vm4 = vcmask 58368  }
  0x62   :  { %v3192_v37 = vld [vmem:[#allocation5 + $0x110] ss:$8 sps:$4 sm:$0xff]   ;;  %s3995_s20 = sld [smem:[#allocation19_spill]]  ;;  %vm1496_vm5 = vcmask 64512  }
  0x64   :  { %577 = vmatpush2.bf16.msra.mxu0 %v3115_v41  ;;  %618 = vmatpush2.bf16.msra.mxu1 %v3116_v42  ;;  %v3198_v41 = vld [vmem:[#allocation5 + $0x100] ss:$8 sps:$4 sm:$0xff]   ;;  %v3203_v42 = vld [vmem:[#allocation5 + $0xf4] ss:$8 sps:$4 sm:$0xff]  }
  0x65   :  { %578 = vmatprep.subr.bf16.mxu0 %v3117_v43  ;;  %619 = vmatprep.subr.bf16.mxu1 %v3119_v44  ;;  %v3206_v43 = vld [vmem:[#allocation5 + $0x1f4] ss:$8 sps:$4 sm:$0xff]   ;;  %v3201_v44 = vld [vmem:[#allocation5 + $0xf0] ss:$8 sps:$4 sm:$0xff]  }
  0x68   :  { %579 = vmatpush2.bf16.msra.mxu0 %v3121_v47  ;;  %620 = vmatpush2.bf16.msra.mxu1 %v3122_v48  ;;  %v3209_v47 = vld [vmem:[#allocation5 + $0xe4] ss:$8 sps:$4 sm:$0xff]  }
  0x69   :  { %580 = vmatprep.subr.bf16.mxu0 %v3123_v49  ;;  %621 = vmatprep.subr.bf16.mxu1 %v3125_v50  ;;  %v3212_v48 = vld [vmem:[#allocation5 + $0x1e4] ss:$8 sps:$4 sm:$0xff]   ;;  %v3207_v49 = vld [vmem:[#allocation5 + $0xe0] ss:$8 sps:$4 sm:$0xff]  }
  0x6a   :  { %v3210_v50 = vld [vmem:[#allocation5 + $0x1e0] ss:$8 sps:$4 sm:$0xff]  }
  0x6c   :  { %581 = vmatpush2.bf16.msra.mxu0 %v3127_v53  ;;  %622 = vmatpush2.bf16.msra.mxu1 %v3128_v54  ;;  %v3213_v53 = vld [vmem:[#allocation5 + $0xd0] ss:$8 sps:$4 sm:$0xff]  }
  0x6d   :  { %582 = vmatprep.subr.bf16.mxu0 %v3129_v56  ;;  %623 = vmatprep.subr.bf16.mxu1 %v3131_v57  ;;  %v3216_v54 = vld [vmem:[#allocation5 + $0x1d0] ss:$8 sps:$4 sm:$0xff]   ;;  %v3224_v56 = vld [vmem:[#allocation5 + $0x1c4] ss:$8 sps:$4 sm:$0xff]   ;;  %v3219_v57 = vld [vmem:[#allocation5 + $0xc0] ss:$8 sps:$4 sm:$0xff]  }
  0x70   :  { %583 = vmatpush2.bf16.msra.mxu0 %v3133_v59  ;;  %624 = vmatpush2.bf16.msra.mxu1 %v3134_v60  ;;  %v3227_v59 = vld [vmem:[#allocation5 + $0xb4] ss:$8 sps:$4 sm:$0xff]  }
  0x71   :  { %584 = vmatprep.subr.bf16.mxu0 %v3135_v61  ;;  %625 = vmatprep.subr.bf16.mxu1 %v3137_v62  ;;  %v3230_v60 = vld [vmem:[#allocation5 + $0x1b4] ss:$8 sps:$4 sm:$0xff]   ;;  %v3225_v61 = vld [vmem:[#allocation5 + $0xb0] ss:$8 sps:$4 sm:$0xff]  }
  0x72   :  { %v3228_v62 = vld [vmem:[#allocation5 + $0x1b0] ss:$8 sps:$4 sm:$0xff]  }
  0x74   :  { %585 = vmatpush2.bf16.msra.mxu0 %v3139_v63  ;;  %626 = vmatpush2.bf16.msra.mxu1 %v3140_v0  ;;  %v3233_v63 = vld [vmem:[#allocation5 + $0xa4] ss:$8 sps:$4 sm:$0xff]  }
  0x75   :  { %586 = vmatprep.subr.bf16.mxu0 %v3141_v1  ;;  %627 = vmatprep.subr.bf16.mxu1 %v3143_v2  ;;  %v3236_v0 = vld [vmem:[#allocation5 + $0x1a4] ss:$8 sps:$4 sm:$0xff]   ;;  %v3231_v1 = vld [vmem:[#allocation5 + $0xa0] ss:$8 sps:$4 sm:$0xff]  }
  0x76   :  { %v3234_v2 = vld [vmem:[#allocation5 + $0x1a0] ss:$8 sps:$4 sm:$0xff]  }
  0x78   :  { %587 = vmatpush2.bf16.msra.mxu0 %v3145_v3  ;;  %628 = vmatpush2.bf16.msra.mxu1 %v3146_v4  ;;  %v3239_v3 = vld [vmem:[#allocation5 + $0x94] ss:$8 sps:$4 sm:$0xff]  }
  0x79   :  { %588 = vmatprep.subr.bf16.mxu0 %v3147_v5  ;;  %629 = vmatprep.subr.bf16.mxu1 %v3149_v6  ;;  %v3242_v4 = vld [vmem:[#allocation5 + $0x194] ss:$8 sps:$4 sm:$0xff]   ;;  %v3237_v5 = vld [vmem:[#allocation5 + $0x90] ss:$8 sps:$4 sm:$0xff]  }
  0x7a   :  { %v3240_v6 = vld [vmem:[#allocation5 + $0x190] ss:$8 sps:$4 sm:$0xff]  }
  0x7c   :  { %589 = vmatpush2.bf16.msra.mxu0 %v3151_v7  ;;  %630 = vmatpush2.bf16.msra.mxu1 %v3152_v8  ;;  %v3245_v7 = vld [vmem:[#allocation5 + $0x84] ss:$8 sps:$4 sm:$0xff]  }
  0x7d   :  { %1044 = vmatprep.subr.bf16.mxu0 %v3155_v9  ;;  %1085 = vmatprep.subr.bf16.mxu1 %v3158_v10  ;;  %v3248_v8 = vld [vmem:[#allocation5 + $0x184] ss:$8 sps:$4 sm:$0xff]   ;;  %v3243_v9 = vld [vmem:[#allocation5 + $0x80] ss:$8 sps:$4 sm:$0xff]  }
  0x7e   :  { %v3246_v10 = vld [vmem:[#allocation5 + $0x180] ss:$8 sps:$4 sm:$0xff]  }
  0x7f   :  { %591 = vmatmul.mubr.bf16.vlgmr.msra.gmra.mxu0 %v228_v11  ;;  %632 = vmatmul.mubr.bf16.vlgmr.msra.gmra.mxu1 %v228_v11  ;;  %v3249_v11 = vld [vmem:[%s3992_s25 + $0x78] sm:$0xff]  }
  0x80   :  { %1045 = vmatpush1.bf16.msra.mxu0 %v3153_v12  ;;  %1086 = vmatpush1.bf16.msra.mxu1 %v3156_v13  ;;  %v3782_v12 = vsub.s32 0, %v3772_v45  ;;  %v203_v13 = vsub.s32 2, %v3772_v45 }
  0x81   :  { %1046 = vmatprep.subr.bf16.mxu0 %v3161_v14  ;;  %1087 = vmatprep.subr.bf16.mxu1 %v3164_v15  ;;  %v191_v14 = vld [vmem:[%s3993_s3] sm:$0xf]  ;;  %v3789_v15 = vsub.s32 1, %v3772_v45 }
  0x84   :  { %1047 = vmatpush1.bf16.msra.mxu0 %v3159_v16  ;;  %1088 = vmatpush1.bf16.msra.mxu1 %v3162_v17  ;;  %v207_v16 = vsub.s32 3, %v3772_v45  ;;  %v196_v17 = vrot.slane %v191_v14, %v3782_v12 }
  0x85   :  { %1048 = vmatprep.subr.bf16.mxu0 %v3167_v18  ;;  %1089 = vmatprep.subr.bf16.mxu1 %v3170_v19  ;;  %v204_v18 = vrot.slane %v191_v14, %v203_v13  ;;  %v200_v19 = vrot.slane %v191_v14, %v3789_v15 }
  0x88   :  { %1049 = vmatpush1.bf16.msra.mxu0 %v3165_v20  ;;  %1090 = vmatpush1.bf16.msra.mxu1 %v3168_v21  ;;  %v208_v20 = vrot.slane %v191_v14, %v207_v16 }
  0x89   :  { %1050 = vmatprep.subr.bf16.mxu0 %v3173_v22  ;;  %1091 = vmatprep.subr.bf16.mxu1 %v3176_v23 }
  0x8c   :  { %1051 = vmatpush1.bf16.msra.mxu0 %v3171_v24  ;;  %1092 = vmatpush1.bf16.msra.mxu1 %v3174_v25 }
  0x8d   :  { %1052 = vmatprep.subr.bf16.mxu0 %v3179_v26  ;;  %1093 = vmatprep.subr.bf16.mxu1 %v3182_v27 }
  0x90   :  { %1053 = vmatpush1.bf16.msra.mxu0 %v3177_v28  ;;  %1094 = vmatpush1.bf16.msra.mxu1 %v3180_v29 }
  0x91   :  { %1054 = vmatprep.subr.bf16.mxu0 %v3185_v30  ;;  %1095 = vmatprep.subr.bf16.mxu1 %v3188_v31 }
  0x94   :  { %1055 = vmatpush1.bf16.msra.mxu0 %v3183_v32  ;;  %1096 = vmatpush1.bf16.msra.mxu1 %v3186_v33 }
  0x95   :  { %1056 = vmatprep.subr.bf16.mxu0 %v3191_v34  ;;  %1097 = vmatprep.subr.bf16.mxu1 %v3194_v35 }
  0x98   :  { %1057 = vmatpush1.bf16.msra.mxu0 %v3189_v36  ;;  %1098 = vmatpush1.bf16.msra.mxu1 %v3192_v37 }
  0x99   :  { %1058 = vmatprep.subr.bf16.mxu0 %v3197_v38  ;;  %1099 = vmatprep.subr.bf16.mxu1 %v3200_v39 }
  0x9c   :  { %1059 = vmatpush1.bf16.msra.mxu0 %v3195_v40  ;;  %1100 = vmatpush1.bf16.msra.mxu1 %v3198_v41  ;;  %v3250_v40 = vld [vmem:[%s3992_s25 + $0x38] sm:$0xff]  }
  0x9d   :  { %1060 = vmatprep.subr.bf16.mxu0 %v3203_v42  ;;  %1101 = vmatprep.subr.bf16.mxu1 %v3206_v43  ;;  %v3251_v42 = vld [vmem:[%s3992_s25 + $0x70] sm:$0xff]  }
  0x9e   :  { %v3252_v43 = vld [vmem:[%s3992_s25 + $0x30] sm:$0xff]  }
  0xa0   :  { %1061 = vmatpush2.bf16.msra.mxu0 %v3201_v44  ;;  %1102 = vmatpush2.bf16.msra.mxu1 %v3204_v46  ;;  %v3253_v44 = vld [vmem:[%s3992_s25 + $0x68] sm:$0xff]  }
  0xa1   :  { %1062 = vmatprep.subr.bf16.mxu0 %v3209_v47  ;;  %1103 = vmatprep.subr.bf16.mxu1 %v3212_v48  ;;  %v3254_v46 = vld [vmem:[%s3992_s25 + $0x28] sm:$0xff]   ;;  %v3255_v47 = vld [vmem:[%s3992_s25 + $0x60] sm:$0xff]  }
  0xa2   :  { %v3256_v48 = vld [vmem:[%s3992_s25 + $0x20] sm:$0xff]  }
  0xa4   :  { %1063 = vmatpush2.bf16.msra.mxu0 %v3207_v49  ;;  %1104 = vmatpush2.bf16.msra.mxu1 %v3210_v50  ;;  %v3257_v49 = vld [vmem:[%s3992_s25 + $0x58] sm:$0xff]  }
  0xa5   :  { %1064 = vmatprep.subr.bf16.mxu0 %v3215_v51  ;;  %1105 = vmatprep.subr.bf16.mxu1 %v3218_v52  ;;  %v3258_v50 = vld [vmem:[%s3992_s25 + $0x18] sm:$0xff]   ;;  %v3259_v51 = vld [vmem:[%s3992_s25 + $0x50] sm:$0xff]  }
  0xa6   :  { %v3260_v52 = vld [vmem:[%s3992_s25 + $0x10] sm:$0xff]  }
  0xa8   :  { %1065 = vmatpush2.bf16.msra.mxu0 %v3213_v53  ;;  %1106 = vmatpush2.bf16.msra.mxu1 %v3216_v54  ;;  %v3261_v53 = vld [vmem:[%s3992_s25 + $0x48] sm:$0xff]  }
  0xa9   :  { %1066 = vmatprep.subr.bf16.mxu0 %v3221_v55  ;;  %1107 = vmatprep.subr.bf16.mxu1 %v3224_v56  ;;  %v3262_v54 = vld [vmem:[%s3992_s25 + $0x8] sm:$0xff]   ;;  %v3263_v55 = vld [vmem:[%s3992_s25 + $0x40] sm:$0xff]  }
  0xaa   :  { %v3264_v56 = vld [vmem:[%s3992_s25] sm:$0xff]  }
  0xac   :  { %1067 = vmatpush2.bf16.msra.mxu0 %v3219_v57  ;;  %1108 = vmatpush2.bf16.msra.mxu1 %v3222_v58  ;;  %v3265_v57 = vld [vmem:[%s3965_s8 + $0x18] sm:$0xff]   ;;  %v3634_v58 = vmov 0.0  }
  0xad   :  { %1068 = vmatprep.subr.bf16.mxu0 %v3227_v59  ;;  %1109 = vmatprep.subr.bf16.mxu1 %v3230_v60  ;;  %v712_v59 = vld [vmem:[%s3994_s29] sm:$0x3]  ;;  %s3638_s29 = smov [#allocation11]  }
  0xae   :  { %v717_v60 = vrot.slane %v712_v59, %v3782_v12  ;;  %s2682_s25 = sshll.u32 %s3638_s29, 4  ;;  %s2683_s25 = int_to_ptr.vmem [resolvable:$true] %s2682_s25 }
  0xb0   :  { %1069 = vmatpush2.bf16.msra.mxu0 %v3225_v61  ;;  %1110 = vmatpush2.bf16.msra.mxu1 %v3228_v62  ;;  %v721_v61 = vrot.slane %v712_v59, %v3789_v15 }
  0xb1   :  { %1070 = vmatprep.subr.bf16.mxu0 %v3233_v63  ;;  %1111 = vmatprep.subr.bf16.mxu1 %v3236_v0 }
  0xb4   :  { %1071 = vmatpush2.bf16.msra.mxu0 %v3231_v1  ;;  %1112 = vmatpush2.bf16.msra.mxu1 %v3234_v2 }
  0xb5   :  { %1072 = vmatprep.subr.bf16.mxu0 %v3239_v3  ;;  %1113 = vmatprep.subr.bf16.mxu1 %v3242_v4 }
  0xb8   :  { %1073 = vmatpush2.bf16.msra.mxu0 %v3237_v5  ;;  %1114 = vmatpush2.bf16.msra.mxu1 %v3240_v6 }
  0xb9   :  { %1074 = vmatprep.subr.bf16.mxu0 %v3245_v7  ;;  %1115 = vmatprep.subr.bf16.mxu1 %v3248_v8 }
  0xbc   :  { %1075 = vmatpush2.bf16.msra.mxu0 %v3243_v9  ;;  %1116 = vmatpush2.bf16.msra.mxu1 %v3246_v10 }
  0xbd   :  { %2996 = vmatprep.subr.bf16.mxu0 %v3249_v11  ;;  %3025 = vmatprep.subr.bf16.mxu1 %v3634_v58 }
 0x13f   :  { %v592_v21 = vpop.f32.mrf.mxu0  ;;  %v633_v22 = vpop.f32.mrf.mxu1 }
 0x140   :  { %v593_v23 = vadd.f32 %v592_v21, %v196_v17  ;;  %v634_v24 = vadd.f32 %v633_v22, %v204_v18  ;;  %v3266_v18 = vld [vmem:[%s3965_s8 + $0x10] sm:$0xff]  }
 0x141   :  { %v594_v25 = vpop.f32.mrf.mxu0  ;;  %v635_v26 = vpop.f32.mrf.mxu1  ;;  %v3271_v21 = vld [vmem:[%s3967_s10 + $0x14] ss:$8 sps:$4 sm:$0xff]  }
 0x142   :  { %v642_v27 = vmax.f32 %v634_v24, 0.0  ;;  %v595_v28 = vadd.f32 %v594_v25, %v200_v19  ;;  %v636_v29 = vadd.f32 %v635_v26, %v208_v20  ;;  %v640_v30 = vmax.f32 %v593_v23, 0.0  ;;  %v3267_v19 = vld [vmem:[%s3965_s8 + $0x8] sm:$0xff]   ;;  %v3268_v20 = vld [vmem:[%s3965_s8] sm:$0xff]  }
 0x143   :  { %v596_v31 = vpop.f32.mrf.mxu0  ;;  %v637_v32 = vpop.f32.mrf.mxu1  ;;  %v2828_v23 = vld [vmem:[%s3964_s7] ss:$0 sm:$0xff] }
 0x144   :  { %v641_v33 = vmax.f32 %v595_v28, 0.0  ;;  %v643_v34 = vmax.f32 %v636_v29, 0.0  ;;  %v646_v35 = vpack.c.bf16 %v642_v27, %v642_v27  ;;  %v644_v41 = vpack.c.bf16 %v640_v30, %v640_v30  ;;  %v3269_v30 = vld [vmem:[%s3967_s10 + $0x10] ss:$8 sps:$4 sm:$0xff]   ;;  %v3274_v32 = vld [vmem:[%s3967_s10 + $0x4] ss:$8 sps:$4 sm:$0xff]  }
 0x145   :  { %v597_v36 = vpop.f32.mrf.mxu0  ;;  %v638_v37 = vpop.f32.mrf.mxu1 }
 0x146   :  { %v645_v38 = vpack.c.bf16 %v641_v33, %v641_v33  ;;  %v647_v39 = vpack.c.bf16 %v643_v34, %v643_v34  ;;  %v3272_v33 = vld [vmem:[%s3967_s10] ss:$8 sps:$4 sm:$0xff]   ;;  %v3636_v34 = vmov 0  }
 0x148   :  { %1076 = vmatprep.mubr.bf16.mxu0 %v645_v38  ;;  %1117 = vmatprep.mubr.bf16.mxu1 %v647_v39 }
 0x149   :  { %1077 = vmatmul.mubr.bf16.vlgmr.msra.gmra.mxu0 %v644_v41  ;;  %1118 = vmatmul.mubr.bf16.vlgmr.msra.gmra.mxu1 %v646_v35  ;;  %v2845_v35 = vld [vmem:[%s3966_s9] ss:$0 sm:$0xff] }
 0x14a   :  { %2997 = vmatpush3.bf16.msra.mxu0 %v3250_v40  ;;  %3026 = vmatpush3.bf16.msra.mxu1 %v3265_v57 }
 0x14b   :  { %2998 = vmatprep.subr.bf16.mxu0 %v3251_v42  ;;  %3027 = vmatprep.subr.bf16.mxu1 %v3634_v58 }
 0x14c   :  { %3033 = vmatprep.mubr.msk.bf16.mxu1 %vm3635_vm0, %v3634_v58 }
 0x14e   :  { %2999 = vmatpush3.bf16.msra.mxu0 %v3252_v43  ;;  %3028 = vmatpush3.bf16.msra.mxu1 %v3266_v18  ;;  %v1488_v43 = vld [vmem:[%s3969_s12] sm:$0xf] }
 0x14f   :  { %3000 = vmatprep.subr.bf16.mxu0 %v3253_v44  ;;  %3029 = vmatprep.subr.bf16.mxu1 %v3634_v58  ;;  %v1502_v44 = vsel %vm1500_vm3, %v1488_v43, 0  ;;  %v3329_v43 = vld [vmem:[#allocation7] ss:$16 sps:$4 sm:$0xff]  }
 0x152   :  { %3001 = vmatpush3.bf16.msra.mxu0 %v3254_v46  ;;  %3030 = vmatpush3.bf16.msra.mxu1 %v3267_v19  ;;  %v3275_v46 = vld [vmem:[%s3971_s14 + $0x30] ss:$8 sps:$4 sm:$0xff]  }
 0x153   :  { %3002 = vmatprep.subr.bf16.mxu0 %v3255_v47  ;;  %3031 = vmatprep.subr.bf16.mxu1 %v3634_v58  ;;  %v3277_v47 = vld [vmem:[%s3971_s14 + $0x34] ss:$8 sps:$4 sm:$0xff]  }
 0x156   :  { %3003 = vmatpush3.bf16.msra.mxu0 %v3256_v48  ;;  %3032 = vmatpush3.bf16.msra.mxu1 %v3268_v20  ;;  %v3280_v48 = vld [vmem:[%s3971_s14 + $0x24] ss:$8 sps:$4 sm:$0xff]   ;;  %v1484_v20 = vld [vmem:[%s3995_s20] sm:$0x3] }
 0x157   :  { %3004 = vmatprep.subr.bf16.mxu0 %v3257_v49  ;;  %1444 = vmatprep.subr.bf16.mxu1 %v3271_v21  ;;  %v3278_v49 = vld [vmem:[%s3971_s14 + $0x20] ss:$8 sps:$4 sm:$0xff]  }
 0x15a   :  { %3005 = vmatpush3.bf16.msra.mxu0 %v3258_v50  ;;  %v3283_v50 = vld [vmem:[%s3971_s14 + $0x14] ss:$8 sps:$4 sm:$0xff]  }
 0x15b   :  { %3006 = vmatprep.subr.bf16.mxu0 %v3259_v51  ;;  %v3281_v51 = vld [vmem:[%s3971_s14 + $0x10] ss:$8 sps:$4 sm:$0xff]  }
 0x15e   :  { %3007 = vmatpush3.bf16.msra.mxu0 %v3260_v52  ;;  %v1396_v52 = vld [vmem:[%s3968_s11] sm:$0x3] }
 0x15f   :  { %3008 = vmatprep.subr.bf16.mxu0 %v3261_v53  ;;  %v1401_v53 = vrot.slane %v1396_v52, %v3782_v12 }
 0x162   :  { %3009 = vmatpush3.bf16.msra.mxu0 %v3262_v54  ;;  %v1405_v54 = vrot.slane %v1396_v52, %v3789_v15  ;;  %v3353_v52 = vld [vmem:[#allocation7 + $0x180] ss:$16 sps:$4 sm:$0xff]  }
 0x163   :  { %3010 = vmatprep.subr.bf16.mxu0 %v3263_v55 }
 0x166   :  { %3011 = vmatpush3.bf16.msra.mxu0 %v3264_v56 }
 0x167   :  { %1617 = vmatprep.subr.bf16.mxu0 %v3277_v47  ;;  %v3343_v47 = vld [vmem:[#allocation7 + $0x1c4] ss:$16 sps:$4 sm:$0xff]  }
 0x209   :  { %v1078_v62 = vpop.f32.mrf.mxu0  ;;  %v1119_v63 = vpop.f32.mrf.mxu1 }
 0x20a   :  { %v1079_v0 = vadd.f32 %v1078_v62, %v717_v60 }
 0x20b   :  { %v1080_v1 = vpop.f32.mrf.mxu0  ;;  %v1121_v2 = vpop.f32.mrf.mxu1 }
 0x20c   :  { %v1120_v3 = vadd.f32 %v1119_v63, %v1079_v0  ;;  %v1081_v4 = vadd.f32 %v1080_v1, %v721_v61 }
 0x20d   :  { %v1082_v5 = vpop.f32.mrf.mxu0  ;;  %v1123_v6 = vpop.f32.mrf.mxu1 }
 0x20e   :  { %v1122_v7 = vadd.f32 %v1121_v2, %v1081_v4  ;;  %v1126_v8 = vmax.f32 %v1120_v3, 0.0 }
 0x20f   :  { %v1083_v9 = vpop.f32.mrf.mxu0  ;;  %v1124_v10 = vpop.f32.mrf.mxu1 }
 0x210   :  { %v1127_v11 = vmax.f32 %v1122_v7, 0.0  ;;  %v1128_v17 = vpack.c.bf16 %v1126_v8, %v1126_v8 }
 0x212   :  { %v1129_v14 = vpack.c.bf16 %v1127_v11, %v1127_v11 }
 0x214   :  { %1297 = vmatprep.mubr.bf16.mxu0 %v1129_v14 }
 0x215   :  { %1298 = vmatmul.mubr.bf16.vlgmr.msra.gmra.mxu0 %v1128_v17 }
 0x216   :  { %1641 = vmatprep.mubr.bf16.mxu0 %v3636_v34  ;;  %1618 = vmatpush1.bf16.msra.mxu0 %v3275_v46  ;;  %v3335_v46 = vld [vmem:[#allocation7 + $0x1e0] ss:$16 sps:$4 sm:$0xff]  }
 0x217   :  { %1619 = vmatprep.subr.bf16.mxu0 %v3280_v48  ;;  %v3341_v48 = vld [vmem:[#allocation7 + $0x1c0] ss:$16 sps:$4 sm:$0xff]  }
 0x21a   :  { %1620 = vmatpush1.bf16.msra.mxu0 %v3278_v49  ;;  %v3349_v49 = vld [vmem:[#allocation7 + $0x1a4] ss:$16 sps:$4 sm:$0xff]  }
 0x21b   :  { %1621 = vmatprep.subr.bf16.mxu0 %v3283_v50  ;;  %v3347_v50 = vld [vmem:[#allocation7 + $0x1a0] ss:$16 sps:$4 sm:$0xff]  }
 0x21e   :  { %1622 = vmatpush1.bf16.msra.mxu0 %v3281_v51  ;;  %v3355_v51 = vld [vmem:[#allocation7 + $0x184] ss:$16 sps:$4 sm:$0xff]  }
 0x2d5   :  { %v3012_v22 = vpop.f32.mrf.mxu0 }
 0x2d7   :  { %v3013_v24 = vpop.f32.mrf.mxu0 }
 0x2d8   :  { %v3014_v25 = vadd.f32 %v3013_v24, %v3012_v22 }
 0x2d9   :  { %v3015_v26 = vpop.f32.mrf.mxu0 }
 0x2da   :  { %v1300_v27 = vadd.f32 %v3014_v25, %v2828_v23  ;;  %v3286_v25 = vld [vmem:[%s3971_s14 + $0x4] ss:$8 sps:$4 sm:$0xff]   ;;  %v3284_v26 = vld [vmem:[%s3971_s14] ss:$8 sps:$4 sm:$0xff]  }
 0x2db   :  { %v3016_v28 = vpop.f32.mrf.mxu0  ;;  %1623 = vmatprep.subr.bf16.mxu0 %v3286_v25  ;;  %v3350_v25 = vld [vmem:[#allocation7 + $0x1a8] ss:$16 sps:$4 sm:$0xff]  }
 0x2dc   :  { %v1305_v29 = vmax.f32 %v1300_v27, 0.0  ;;  %1624 = vmatpush1.bf16.msra.mxu0 %v3284_v26  ;;  %v3287_v27 = vld [vmem:[#allocation7 + $0xe0] ss:$16 sps:$4 sm:$0xff]   ;;  %v3289_v28 = vld [vmem:[#allocation7 + $0xe4] ss:$16 sps:$4 sm:$0xff]  }
 0x2dd   :  { %v3358_v26 = vld [vmem:[#allocation7 + $0x18c] ss:$16 sps:$4 sm:$0xff]  }
 0x2de   :  { %v1306_v31 = vpack.c.bf16 %v1305_v29, %v1305_v29  ;;  %v3292_v29 = vld [vmem:[#allocation7 + $0xec] ss:$16 sps:$4 sm:$0xff]  }
 0x2df   :  { %2101 = vmatprep.subr.bf16.mxu0 %v3292_v29  ;;  %v3362_v29 = vld [vmem:[#allocation7 + $0x168] ss:$16 sps:$4 sm:$0xff]  }
 0x2e0   :  { %3034 = vmatmul.mubr.msk.bf16.vlgmr.msra.gmra.mxu1 %vm1346_vm1, %v1306_v31  ;;  %v3293_v31 = vld [vmem:[#allocation7 + $0xc0] ss:$16 sps:$4 sm:$0xff]  }
 0x2e1   :  { %1445 = vmatpush1.bf16.msra.mxu1 %v3269_v30  ;;  %1464 = vmatprep.mubr.bf16.mxu1 %v3636_v34  ;;  %v3295_v30 = vld [vmem:[#allocation7 + $0xc4] ss:$16 sps:$4 sm:$0xff]  }
 0x2e2   :  { %1446 = vmatprep.subr.bf16.mxu1 %v3274_v32  ;;  %v3301_v32 = vld [vmem:[#allocation7 + $0xa4] ss:$16 sps:$4 sm:$0xff]  }
 0x2e3   :  { %v3307_v34 = vld [vmem:[#allocation7 + $0x84] ss:$16 sps:$4 sm:$0xff]  }
 0x2e5   :  { %1447 = vmatpush1.bf16.msra.mxu1 %v3272_v33  ;;  %v3299_v33 = vld [vmem:[#allocation7 + $0xa0] ss:$16 sps:$4 sm:$0xff]  }
 0x2e6   :  { %3037 = vmatprep.subr.bf16.mxu1 %v3634_v58 }
 0x3a0   :  { %v1384_v36 = vpop.f32.mrf.mxu1 }
 0x3a1   :  { %v1385_v37 = vadd.f32 %v2845_v35, %v1384_v36  ;;  %v3305_v35 = vld [vmem:[#allocation7 + $0x80] ss:$16 sps:$4 sm:$0xff]   ;;  %v3313_v36 = vld [vmem:[#allocation7 + $0x64] ss:$16 sps:$4 sm:$0xff]  }
 0x3a2   :  { %v3035_v38 = vpop.f32.mrf.mxu1 }
 0x3a3   :  { %v1390_v39 = vmax.f32 %v1385_v37, 0.0  ;;  %v3311_v37 = vld [vmem:[#allocation7 + $0x60] ss:$16 sps:$4 sm:$0xff]   ;;  %v3319_v38 = vld [vmem:[#allocation7 + $0x44] ss:$16 sps:$4 sm:$0xff]  }
 0x3a4   :  { %v1387_v40 = vpop.f32.mrf.mxu1 }
 0x3a5   :  { %v1391_v41 = vpack.c.bf16 %v1390_v39, %v1390_v39  ;;  %v3317_v39 = vld [vmem:[#allocation7 + $0x40] ss:$16 sps:$4 sm:$0xff]   ;;  %v3325_v40 = vld [vmem:[#allocation7 + $0x24] ss:$16 sps:$4 sm:$0xff]  }
 0x3a6   :  { %v3036_v42 = vpop.f32.mrf.mxu1 }
 0x3a7   :  { %2855 = vmatmul.mubr.msk.bf16.vlgmr.msra.gmra.mxu1 %vm1428_vm2, %v1391_v41  ;;  %v3323_v41 = vld [vmem:[#allocation7 + $0x20] ss:$16 sps:$4 sm:$0xff]   ;;  %v3331_v42 = vld [vmem:[#allocation7 + $0x4] ss:$16 sps:$4 sm:$0xff]  }
 0x3a8   :  { %3039 = vmatprep.mubr.msk.bf16.mxu1 %vm3635_vm0, %v3634_v58  ;;  %3038 = vmatpush3.bf16.msra.mxu1 %v1502_v44  ;;  %v3337_v44 = vld [vmem:[#allocation7 + $0x1e4] ss:$16 sps:$4 sm:$0xff]  }
 0x3a9   :  { %2060 = vmatprep.subr.bf16.mxu1 %v3289_v28  ;;  %v3364_v28 = vld [vmem:[#allocation7 + $0x16c] ss:$16 sps:$4 sm:$0xff]  }
 0x467   :  { %v1466_v55 = vpop.f32.mrf.mxu1 }
 0x468   :  { %v1467_v56 = vadd.f32 %v1466_v55, %v1401_v53  ;;  %v3361_v53 = vld [vmem:[#allocation7 + $0x164] ss:$16 sps:$4 sm:$0xff]  }
 0x469   :  { %v1468_v57 = vpop.f32.mrf.mxu1  ;;  %v3367_v55 = vld [vmem:[#allocation7 + $0x144] ss:$16 sps:$4 sm:$0xff]  }
 0x46a   :  { %v1469_v58 = vadd.f32 %v1468_v57, %v1405_v54  ;;  %2653 = vst.msk [vmem:[#allocation10] sm:$0x3] %vm2652_vm4, %v1467_v56  ;;  %v3359_v54 = vld [vmem:[#allocation7 + $0x160] ss:$16 sps:$4 sm:$0xff]  }
 0x46b   :  { %v1470_v59 = vpop.f32.mrf.mxu1  ;;  %v2856_v57 = vld [vmem:[%s3970_s13] ss:$0 sm:$0xff] }
 0x46c   :  { %v1473_v60 = vmax.f32 %v1469_v58, -10.0  ;;  %v2655_v61 = vand.u32 2147483647, %v1469_v58  ;;  %v2654_v10 = vmax.f32 %v1469_v58, 0.0 }
 0x46d   :  { %v1471_v62 = vpop.f32.mrf.mxu1 }
 0x46e   :  { %v1474_v63 = vmin.f32 %v1473_v60, 3.0  ;;  %v2656_v0 = vsub.f32 0.0, %v2655_v61 }
 0x470   :  { %v1476_v1 = vand.u32 2147483647, %v1474_v63  ;;  %v2657_v2 = vmul.f32 1.442695, %v2656_v0  ;;  %v1475_v18 = vmax.f32 %v1474_v63, 0.0 }
 0x471   :  { %v3290_v63 = vld [vmem:[#allocation7 + $0xe8] ss:$16 sps:$4 sm:$0xff]  }
 0x472   :  { %v1477_v3 = vsub.f32 0.0, %v1476_v1  ;;  %3479 = vpow2.f32 %v2657_v2  ;;  %v3298_v1 = vld [vmem:[#allocation7 + $0xcc] ss:$16 sps:$4 sm:$0xff]  }
 0x474   :  { %v1478_v4 = vmul.f32 1.442695, %v1477_v3  ;;  %v3296_v3 = vld [vmem:[#allocation7 + $0xc8] ss:$16 sps:$4 sm:$0xff]  }
 0x476   :  { %3481 = vpow2.f32 %v1478_v4  ;;  %v3304_v4 = vld [vmem:[#allocation7 + $0xac] ss:$16 sps:$4 sm:$0xff]  }
 0x47f   :  { %v3480_v5 = vpop.eup %3479 }
 0x480   :  { %v2659_v6 = vadd.f32 1.0, %v3480_v5  ;;  %v3302_v5 = vld [vmem:[#allocation7 + $0xa8] ss:$16 sps:$4 sm:$0xff]  }
 0x482   :  { %3483 = vlog2.f32 %v2659_v6  ;;  %v3310_v6 = vld [vmem:[#allocation7 + $0x8c] ss:$16 sps:$4 sm:$0xff]  }
 0x483   :  { %v3482_v7 = vpop.eup %3481 }
 0x484   :  { %v1480_v8 = vadd.f32 1.0, %v3482_v7  ;;  %v3308_v7 = vld [vmem:[#allocation7 + $0x88] ss:$16 sps:$4 sm:$0xff]  }
 0x486   :  { %3485 = vlog2.f32 %v1480_v8  ;;  %v3316_v8 = vld [vmem:[#allocation7 + $0x6c] ss:$16 sps:$4 sm:$0xff]  }
 0x48f   :  { %v3484_v9 = vpop.eup %3483 }
 0x490   :  { %v2661_v11 = vmul.f32 0.6931472, %v3484_v9  ;;  %v3314_v9 = vld [vmem:[#allocation7 + $0x68] ss:$16 sps:$4 sm:$0xff]  }
 0x492   :  { %v2662_v14 = vadd.f32 %v2661_v11, %v2654_v10  ;;  %v3322_v10 = vld [vmem:[#allocation7 + $0x4c] ss:$16 sps:$4 sm:$0xff]   ;;  %v3320_v11 = vld [vmem:[#allocation7 + $0x48] ss:$16 sps:$4 sm:$0xff]  }
 0x493   :  { %v3486_v17 = vpop.eup %3485 }
 0x494   :  { %v1482_v19 = vmul.f32 0.6931472, %v3486_v17  ;;  %2663 = vst.msk [vmem:[#allocation11] sm:$0x3] %vm2652_vm4, %v2662_v14  ;;  %v3328_v14 = vld [vmem:[#allocation7 + $0x2c] ss:$16 sps:$4 sm:$0xff]  }
 0x495   :  { %v3326_v17 = vld [vmem:[#allocation7 + $0x28] ss:$16 sps:$4 sm:$0xff]  }
 0x496   :  { %v1483_v21 = vadd.f32 %v1482_v19, %v1475_v18  ;;  %v3334_v18 = vld [vmem:[#allocation7 + $0xc] ss:$16 sps:$4 sm:$0xff]   ;;  %v3332_v19 = vld [vmem:[#allocation7 + $0x8] ss:$16 sps:$4 sm:$0xff]  }
 0x498   :  { %v1485_v22 = vmul.f32 %v1484_v20, %v1483_v21  ;;  %v3340_v20 = vld [vmem:[#allocation7 + $0x1ec] ss:$16 sps:$4 sm:$0xff]   ;;  %v3338_v21 = vld [vmem:[#allocation7 + $0x1e8] ss:$16 sps:$4 sm:$0xff]  }
 0x49a   :  { %v1486_v23 = vadd.f32 %v1485_v22, %v1467_v56  ;;  %v3365_v56 = vld [vmem:[#allocation7 + $0x140] ss:$16 sps:$4 sm:$0xff]   ;;  %v3346_v22 = vld [vmem:[#allocation7 + $0x1cc] ss:$16 sps:$4 sm:$0xff]  }
 0x49c   :  { %v1487_v24 = vpack.c.bf16 %v1486_v23, %v1486_v23  ;;  %v3344_v23 = vld [vmem:[#allocation7 + $0x1c8] ss:$16 sps:$4 sm:$0xff]  }
 0x49e   :  { %3040 = vmatmul.mubr.msk.bf16.vlgmr.msra.gmra.mxu1 %vm1496_vm5, %v1487_v24  ;;  %v3352_v24 = vld [vmem:[#allocation7 + $0x1ac] ss:$16 sps:$4 sm:$0xff]  }
 0x49f   :  { %2061 = vmatpush1.bf16.msra.mxu1 %v3287_v27  ;;  %v3356_v27 = vld [vmem:[#allocation7 + $0x188] ss:$16 sps:$4 sm:$0xff]  }
 0x4a0   :  { %2062 = vmatprep.subr.bf16.mxu1 %v3295_v30  ;;  %v3370_v30 = vld [vmem:[#allocation7 + $0x14c] ss:$16 sps:$4 sm:$0xff]  }
 0x4a3   :  { %2063 = vmatpush1.bf16.msra.mxu1 %v3293_v31  ;;  %v3368_v31 = vld [vmem:[#allocation7 + $0x148] ss:$16 sps:$4 sm:$0xff]  }
 0x4a4   :  { %2064 = vmatprep.subr.bf16.mxu1 %v3301_v32  ;;  %v3373_v32 = vld [vmem:[#allocation7 + $0x124] ss:$16 sps:$4 sm:$0xff]  }
 0x4a7   :  { %2065 = vmatpush1.bf16.msra.mxu1 %v3299_v33  ;;  %v3376_v33 = vld [vmem:[#allocation7 + $0x12c] ss:$16 sps:$4 sm:$0xff]  }
 0x4a8   :  { %2066 = vmatprep.subr.bf16.mxu1 %v3307_v34  ;;  %v3371_v34 = vld [vmem:[#allocation7 + $0x120] ss:$16 sps:$4 sm:$0xff]  }
 0x4ab   :  { %2067 = vmatpush1.bf16.msra.mxu1 %v3305_v35  ;;  %v3374_v35 = vld [vmem:[#allocation7 + $0x128] ss:$16 sps:$4 sm:$0xff]  }
 0x4ac   :  { %2068 = vmatprep.subr.bf16.mxu1 %v3313_v36  ;;  %v3379_v36 = vld [vmem:[#allocation7 + $0x104] ss:$16 sps:$4 sm:$0xff]  }
 0x4af   :  { %2069 = vmatpush1.bf16.msra.mxu1 %v3311_v37  ;;  %v3382_v37 = vld [vmem:[#allocation7 + $0x10c] ss:$16 sps:$4 sm:$0xff]  }
 0x4b0   :  { %2070 = vmatprep.subr.bf16.mxu1 %v3319_v38  ;;  %v3377_v38 = vld [vmem:[#allocation7 + $0x100] ss:$16 sps:$4 sm:$0xff]  }
 0x4b3   :  { %2071 = vmatpush1.bf16.msra.mxu1 %v3317_v39  ;;  %v3380_v39 = vld [vmem:[#allocation7 + $0x108] ss:$16 sps:$4 sm:$0xff]  }
 0x4b4   :  { %2072 = vmatprep.subr.bf16.mxu1 %v3325_v40  ;;  %v3385_v40 = vld [vmem:[#allocation8 + $0x74] ss:$8 sps:$4 sm:$0xff]  }
 0x4b7   :  { %2073 = vmatpush1.bf16.msra.mxu1 %v3323_v41  ;;  %v3388_v41 = vld [vmem:[#allocation8 + $0x174] ss:$8 sps:$4 sm:$0xff]  }
 0x4b8   :  { %2074 = vmatprep.subr.bf16.mxu1 %v3331_v42  ;;  %v1554_v42 = vld [vmem:[%s3972_s15] sm:$0x3] }
 0x4bb   :  { %2075 = vmatpush1.bf16.msra.mxu1 %v3329_v43  ;;  %v1559_v43 = vrot.slane %v1554_v42, %v3782_v12 }
 0x4bc   :  { %2076 = vmatprep.subr.bf16.mxu1 %v3337_v44  ;;  %v1563_v44 = vrot.slane %v1554_v42, %v3789_v15  ;;  %v3457_v42 = vld [vmem:[#allocation8 + $0xb4] ss:$8 sps:$4 sm:$0xff]  }
 0x4bf   :  { %2077 = vmatpush2.bf16.msra.mxu1 %v3335_v46 }
 0x4c0   :  { %2078 = vmatprep.subr.bf16.mxu1 %v3343_v47 }
 0x4c3   :  { %2079 = vmatpush2.bf16.msra.mxu1 %v3341_v48 }
 0x4c4   :  { %2080 = vmatprep.subr.bf16.mxu1 %v3349_v49 }
 0x4c7   :  { %2081 = vmatpush2.bf16.msra.mxu1 %v3347_v50 }
 0x4c8   :  { %2082 = vmatprep.subr.bf16.mxu1 %v3355_v51 }
 0x4cb   :  { %2083 = vmatpush2.bf16.msra.mxu1 %v3353_v52 }
 0x4cc   :  { %2084 = vmatprep.subr.bf16.mxu1 %v3361_v53 }
 0x4cf   :  { %2085 = vmatpush2.bf16.msra.mxu1 %v3359_v54 }
 0x4d0   :  { %2086 = vmatprep.subr.bf16.mxu1 %v3367_v55  ;;  %v3383_v55 = vld [vmem:[#allocation8 + $0x70] ss:$8 sps:$4 sm:$0xff]  }
 0x4d3   :  { %2087 = vmatpush2.bf16.msra.mxu1 %v3365_v56  ;;  %v3386_v56 = vld [vmem:[#allocation8 + $0x170] ss:$8 sps:$4 sm:$0xff]  }
 0x4d4   :  { %2088 = vmatprep.subr.bf16.mxu1 %v3373_v32  ;;  %v3437_v32 = vld [vmem:[#allocation8 + $0xe0] ss:$8 sps:$4 sm:$0xff]  }
 0x4d7   :  { %2089 = vmatpush2.bf16.msra.mxu1 %v3371_v34  ;;  %v3445_v34 = vld [vmem:[#allocation8 + $0xd4] ss:$8 sps:$4 sm:$0xff]  }
 0x4d8   :  { %2090 = vmatprep.subr.bf16.mxu1 %v3379_v36  ;;  %v3443_v36 = vld [vmem:[#allocation8 + $0xd0] ss:$8 sps:$4 sm:$0xff]  }
 0x4db   :  { %2091 = vmatpush2.bf16.msra.mxu1 %v3377_v38  ;;  %v3451_v38 = vld [vmem:[#allocation8 + $0xc4] ss:$8 sps:$4 sm:$0xff]  }
 0x4dc   :  { %2546 = vmatprep.subr.bf16.mxu1 %v3385_v40  ;;  %v3449_v40 = vld [vmem:[#allocation8 + $0xc0] ss:$8 sps:$4 sm:$0xff]  }
 0x55e   :  { %v1538_v58 = vpop.f32.mrf.mxu1 }
 0x55f   :  { %v1539_v59 = vadd.f32 %v2856_v57, %v1538_v58  ;;  %v3391_v58 = vld [vmem:[#allocation8 + $0x64] ss:$8 sps:$4 sm:$0xff]  }
 0x560   :  { %v3041_v60 = vpop.f32.mrf.mxu1 }
 0x561   :  { %v1544_v61 = vmax.f32 %v1539_v59, 0.0  ;;  %v3394_v59 = vld [vmem:[#allocation8 + $0x164] ss:$8 sps:$4 sm:$0xff]   ;;  %v3389_v60 = vld [vmem:[#allocation8 + $0x60] ss:$8 sps:$4 sm:$0xff]  }
 0x562   :  { %v1541_v62 = vpop.f32.mrf.mxu1 }
 0x563   :  { %v1545_v0 = vpack.c.bf16 %v1544_v61, %v1544_v61  ;;  %v3392_v61 = vld [vmem:[#allocation8 + $0x160] ss:$8 sps:$4 sm:$0xff]   ;;  %v3397_v62 = vld [vmem:[#allocation8 + $0x54] ss:$8 sps:$4 sm:$0xff]  }
 0x564   :  { %v3042_v2 = vpop.f32.mrf.mxu1 }
 0x565   :  { %2866 = vmatmul.mubr.msk.bf16.vlgmr.msra.gmra.mxu0 %vm1346_vm1, %v1545_v0  ;;  %v3395_v0 = vld [vmem:[#allocation8 + $0x50] ss:$8 sps:$4 sm:$0xff]   ;;  %v3403_v2 = vld [vmem:[#allocation8 + $0x44] ss:$8 sps:$4 sm:$0xff]  }
 0x566   :  { %2102 = vmatpush1.bf16.msra.mxu0 %v3290_v63  ;;  %v3400_v63 = vld [vmem:[#allocation8 + $0x154] ss:$8 sps:$4 sm:$0xff]  }
 0x567   :  { %2103 = vmatprep.subr.bf16.mxu0 %v3298_v1  ;;  %v3398_v1 = vld [vmem:[#allocation8 + $0x150] ss:$8 sps:$4 sm:$0xff]  }
 0x56a   :  { %2104 = vmatpush1.bf16.msra.mxu0 %v3296_v3  ;;  %v3406_v3 = vld [vmem:[#allocation8 + $0x144] ss:$8 sps:$4 sm:$0xff]  }
 0x56b   :  { %2105 = vmatprep.subr.bf16.mxu0 %v3304_v4  ;;  %v3401_v4 = vld [vmem:[#allocation8 + $0x40] ss:$8 sps:$4 sm:$0xff]  }
 0x56e   :  { %2106 = vmatpush1.bf16.msra.mxu0 %v3302_v5  ;;  %v3404_v5 = vld [vmem:[#allocation8 + $0x140] ss:$8 sps:$4 sm:$0xff]  }
 0x56f   :  { %2107 = vmatprep.subr.bf16.mxu0 %v3310_v6  ;;  %v3409_v6 = vld [vmem:[#allocation8 + $0x34] ss:$8 sps:$4 sm:$0xff]  }
 0x572   :  { %2108 = vmatpush1.bf16.msra.mxu0 %v3308_v7  ;;  %v3412_v7 = vld [vmem:[#allocation8 + $0x134] ss:$8 sps:$4 sm:$0xff]  }
 0x573   :  { %2109 = vmatprep.subr.bf16.mxu0 %v3316_v8  ;;  %v3407_v8 = vld [vmem:[#allocation8 + $0x30] ss:$8 sps:$4 sm:$0xff]  }
 0x576   :  { %2110 = vmatpush1.bf16.msra.mxu0 %v3314_v9  ;;  %v3410_v9 = vld [vmem:[#allocation8 + $0x130] ss:$8 sps:$4 sm:$0xff]  }
 0x577   :  { %2111 = vmatprep.subr.bf16.mxu0 %v3322_v10  ;;  %v3415_v10 = vld [vmem:[#allocation8 + $0x24] ss:$8 sps:$4 sm:$0xff]  }
 0x57a   :  { %2112 = vmatpush1.bf16.msra.mxu0 %v3320_v11  ;;  %v3418_v11 = vld [vmem:[#allocation8 + $0x124] ss:$8 sps:$4 sm:$0xff]  }
 0x57b   :  { %2113 = vmatprep.subr.bf16.mxu0 %v3328_v14  ;;  %v3413_v14 = vld [vmem:[#allocation8 + $0x20] ss:$8 sps:$4 sm:$0xff]  }
 0x57e   :  { %2114 = vmatpush1.bf16.msra.mxu0 %v3326_v17  ;;  %v3416_v17 = vld [vmem:[#allocation8 + $0x120] ss:$8 sps:$4 sm:$0xff]  }
 0x57f   :  { %2115 = vmatprep.subr.bf16.mxu0 %v3334_v18  ;;  %v3421_v18 = vld [vmem:[#allocation8 + $0x14] ss:$8 sps:$4 sm:$0xff]  }
 0x582   :  { %2116 = vmatpush1.bf16.msra.mxu0 %v3332_v19  ;;  %v3424_v19 = vld [vmem:[#allocation8 + $0x114] ss:$8 sps:$4 sm:$0xff]  }
 0x583   :  { %2117 = vmatprep.subr.bf16.mxu0 %v3340_v20  ;;  %v3419_v20 = vld [vmem:[#allocation8 + $0x10] ss:$8 sps:$4 sm:$0xff]  }
 0x586   :  { %2118 = vmatpush2.bf16.msra.mxu0 %v3338_v21  ;;  %v3422_v21 = vld [vmem:[#allocation8 + $0x110] ss:$8 sps:$4 sm:$0xff]  }
 0x587   :  { %2119 = vmatprep.subr.bf16.mxu0 %v3346_v22  ;;  %v3427_v22 = vld [vmem:[#allocation8 + $0x4] ss:$8 sps:$4 sm:$0xff]  }
 0x58a   :  { %2120 = vmatpush2.bf16.msra.mxu0 %v3344_v23  ;;  %v3430_v23 = vld [vmem:[#allocation8 + $0x104] ss:$8 sps:$4 sm:$0xff]  }
 0x58b   :  { %2121 = vmatprep.subr.bf16.mxu0 %v3352_v24  ;;  %v3425_v24 = vld [vmem:[#allocation8] ss:$8 sps:$4 sm:$0xff]  }
 0x58e   :  { %2122 = vmatpush2.bf16.msra.mxu0 %v3350_v25  ;;  %v3428_v25 = vld [vmem:[#allocation8 + $0x100] ss:$8 sps:$4 sm:$0xff]  }
 0x58f   :  { %2123 = vmatprep.subr.bf16.mxu0 %v3358_v26  ;;  %v3433_v26 = vld [vmem:[#allocation8 + $0xf4] ss:$8 sps:$4 sm:$0xff]  }
 0x592   :  { %2124 = vmatpush2.bf16.msra.mxu0 %v3356_v27  ;;  %v3436_v27 = vld [vmem:[#allocation8 + $0x1f4] ss:$8 sps:$4 sm:$0xff]  }
 0x593   :  { %2125 = vmatprep.subr.bf16.mxu0 %v3364_v28  ;;  %v3431_v28 = vld [vmem:[#allocation8 + $0xf0] ss:$8 sps:$4 sm:$0xff]  }
 0x596   :  { %2126 = vmatpush2.bf16.msra.mxu0 %v3362_v29  ;;  %v3434_v29 = vld [vmem:[#allocation8 + $0x1f0] ss:$8 sps:$4 sm:$0xff]  }
 0x597   :  { %2127 = vmatprep.subr.bf16.mxu0 %v3370_v30  ;;  %v3439_v30 = vld [vmem:[#allocation8 + $0xe4] ss:$8 sps:$4 sm:$0xff]  }
 0x59a   :  { %2128 = vmatpush2.bf16.msra.mxu0 %v3368_v31  ;;  %v3442_v31 = vld [vmem:[#allocation8 + $0x1e4] ss:$8 sps:$4 sm:$0xff]  }
 0x59b   :  { %2129 = vmatprep.subr.bf16.mxu0 %v3376_v33  ;;  %v3440_v33 = vld [vmem:[#allocation8 + $0x1e0] ss:$8 sps:$4 sm:$0xff]  }
 0x59e   :  { %2130 = vmatpush2.bf16.msra.mxu0 %v3374_v35  ;;  %v3448_v35 = vld [vmem:[#allocation8 + $0x1d4] ss:$8 sps:$4 sm:$0xff]  }
 0x59f   :  { %2131 = vmatprep.subr.bf16.mxu0 %v3382_v37  ;;  %v3446_v37 = vld [vmem:[#allocation8 + $0x1d0] ss:$8 sps:$4 sm:$0xff]  }
 0x5a2   :  { %2132 = vmatpush2.bf16.msra.mxu0 %v3380_v39  ;;  %v3454_v39 = vld [vmem:[#allocation8 + $0x1c4] ss:$8 sps:$4 sm:$0xff]  }
 0x5a3   :  { %2587 = vmatprep.subr.bf16.mxu0 %v3388_v41  ;;  %v3452_v41 = vld [vmem:[#allocation8 + $0x1c0] ss:$8 sps:$4 sm:$0xff]  }
 0x625   :  { %v1643_v46 = vpop.f32.mrf.mxu0 }
 0x626   :  { %v1644_v47 = vadd.f32 %v1643_v46, %v1559_v43  ;;  %v3460_v43 = vld [vmem:[#allocation8 + $0x1b4] ss:$8 sps:$4 sm:$0xff]   ;;  %v3458_v46 = vld [vmem:[#allocation8 + $0x1b0] ss:$8 sps:$4 sm:$0xff]  }
 0x627   :  { %v1645_v48 = vpop.f32.mrf.mxu0 }
 0x628   :  { %v1646_v49 = vadd.f32 %v1645_v48, %v1563_v44  ;;  %v1650_v50 = vmax.f32 %v1644_v47, 0.0  ;;  %v3455_v44 = vld [vmem:[#allocation8 + $0xb0] ss:$8 sps:$4 sm:$0xff]   ;;  %v3463_v47 = vld [vmem:[#allocation8 + $0xa4] ss:$8 sps:$4 sm:$0xff]  }
 0x629   :  { %v1647_v51 = vpop.f32.mrf.mxu0  ;;  %v3466_v48 = vld [vmem:[#allocation8 + $0x1a4] ss:$8 sps:$4 sm:$0xff]  }
 0x62a   :  { %v1651_v52 = vmax.f32 %v1646_v49, 0.0  ;;  %v1652_v57 = vpack.c.bf16 %v1650_v50, %v1650_v50  ;;  %v3461_v49 = vld [vmem:[#allocation8 + $0xa0] ss:$8 sps:$4 sm:$0xff]   ;;  %v3469_v51 = vld [vmem:[#allocation8 + $0x94] ss:$8 sps:$4 sm:$0xff]  }
 0x62b   :  { %v1648_v53 = vpop.f32.mrf.mxu0  ;;  %v3464_v50 = vld [vmem:[#allocation8 + $0x1a0] ss:$8 sps:$4 sm:$0xff]  }
 0x62c   :  { %v1653_v54 = vpack.c.bf16 %v1651_v52, %v1651_v52  ;;  %v3472_v52 = vld [vmem:[#allocation8 + $0x194] ss:$8 sps:$4 sm:$0xff]   ;;  %v3467_v53 = vld [vmem:[#allocation8 + $0x90] ss:$8 sps:$4 sm:$0xff]  }
 0x62e   :  { %2092 = vmatprep.mubr.bf16.mxu1 %v1653_v54  ;;  %2133 = vmatprep.mubr.bf16.mxu0 %v1653_v54  ;;  %v3470_v54 = vld [vmem:[#allocation8 + $0x190] ss:$8 sps:$4 sm:$0xff]  }
 0x62f   :  { %2093 = vmatmul.mubr.bf16.vlgmr.msra.gmra.mxu1 %v1652_v57  ;;  %2134 = vmatmul.mubr.bf16.vlgmr.msra.gmra.mxu0 %v1652_v57  ;;  %v3473_v57 = vld [vmem:[#allocation8 + $0x80] ss:$8 sps:$4 sm:$0xff]  }
 0x630   :  { %2547 = vmatpush1.bf16.msra.mxu1 %v3383_v55  ;;  %2588 = vmatpush1.bf16.msra.mxu0 %v3386_v56  ;;  %v3475_v55 = vld [vmem:[#allocation8 + $0x84] ss:$8 sps:$4 sm:$0xff]  }
 0x631   :  { %2548 = vmatprep.subr.bf16.mxu1 %v3391_v58  ;;  %2589 = vmatprep.subr.bf16.mxu0 %v3394_v59  ;;  %v3478_v56 = vld [vmem:[#allocation8 + $0x184] ss:$8 sps:$4 sm:$0xff]   ;;  %v3476_v58 = vld [vmem:[#allocation8 + $0x180] ss:$8 sps:$4 sm:$0xff]  }
 0x632   :  { %v1718_v59 = vld [vmem:[%s3974_s17] sm:$0xf]  ;;  %s3637_s17 = smov [#allocation10]  }
 0x633   :  { %s2672_s9 = sshll.u32 %s3637_s17, 4  ;;  %s2673_s9 = int_to_ptr.vmem [resolvable:$true] %s2672_s9 }
 0x634   :  { %2549 = vmatpush1.bf16.msra.mxu1 %v3389_v60  ;;  %2590 = vmatpush1.bf16.msra.mxu0 %v3392_v61  ;;  %v1723_v60 = vrot.slane %v1718_v59, %v3782_v12  ;;  %v1731_v61 = vrot.slane %v1718_v59, %v203_v13  ;;  %s3575_s0 = scalar_lea.vmem %s2673_s9, 32  ;;  %p3580_p7 = scmp.lt.s32.totalorder %s2673_s9, %s2673_s9 }
 0x635   :  { %2550 = vmatprep.subr.bf16.mxu1 %v3397_v62  ;;  %2591 = vmatprep.subr.bf16.mxu0 %v3400_v63  ;;  %v1727_v62 = vrot.slane %v1718_v59, %v3789_v15  ;;  %v1735_v63 = vrot.slane %v1718_v59, %v207_v16  ;;  %p3576_p6 = scmp.ne.s32.totalorder %s2673_s9, %s3575_s0  ;;  %p3581_p8 = scmp.lt.s32.totalorder %s3575_s0, %s3575_s0 }
 0x637   :  { %p3582_p9 = por %p3581_p8, %p3580_p7 }
 0x638   :  { %2551 = vmatpush1.bf16.msra.mxu1 %v3395_v0  ;;  %2592 = vmatpush1.bf16.msra.mxu0 %v3398_v1 }
 0x639   :  { %2552 = vmatprep.subr.bf16.mxu1 %v3403_v2  ;;  %2593 = vmatprep.subr.bf16.mxu0 %v3406_v3  ;;  %p3583_p10 = pnand %p3582_p9, %p3576_p6 }
 0x63c   :  { %2553 = vmatpush1.bf16.msra.mxu1 %v3401_v4  ;;  %2594 = vmatpush1.bf16.msra.mxu0 %v3404_v5 }
 0x63d   :  { %2554 = vmatprep.subr.bf16.mxu1 %v3409_v6  ;;  %2595 = vmatprep.subr.bf16.mxu0 %v3412_v7 }
 0x640   :  { %2555 = vmatpush1.bf16.msra.mxu1 %v3407_v8  ;;  %2596 = vmatpush1.bf16.msra.mxu0 %v3410_v9 }
 0x641   :  { %2556 = vmatprep.subr.bf16.mxu1 %v3415_v10  ;;  %2597 = vmatprep.subr.bf16.mxu0 %v3418_v11 }
 0x644   :  { %2557 = vmatpush1.bf16.msra.mxu1 %v3413_v14  ;;  %2598 = vmatpush1.bf16.msra.mxu0 %v3416_v17 }
 0x645   :  { %2558 = vmatprep.subr.bf16.mxu1 %v3421_v18  ;;  %2599 = vmatprep.subr.bf16.mxu0 %v3424_v19 }
 0x648   :  { %2559 = vmatpush1.bf16.msra.mxu1 %v3419_v20  ;;  %2600 = vmatpush1.bf16.msra.mxu0 %v3422_v21 }
 0x649   :  { %2560 = vmatprep.subr.bf16.mxu1 %v3427_v22  ;;  %2601 = vmatprep.subr.bf16.mxu0 %v3430_v23 }
 0x64c   :  { %2561 = vmatpush1.bf16.msra.mxu1 %v3425_v24  ;;  %2602 = vmatpush1.bf16.msra.mxu0 %v3428_v25 }
 0x64d   :  { %2562 = vmatprep.subr.bf16.mxu1 %v3433_v26  ;;  %2603 = vmatprep.subr.bf16.mxu0 %v3436_v27 }
 0x650   :  { %2563 = vmatpush2.bf16.msra.mxu1 %v3431_v28  ;;  %2604 = vmatpush2.bf16.msra.mxu0 %v3434_v29 }
 0x651   :  { %2564 = vmatprep.subr.bf16.mxu1 %v3439_v30  ;;  %2605 = vmatprep.subr.bf16.mxu0 %v3442_v31 }
 0x654   :  { %2565 = vmatpush2.bf16.msra.mxu1 %v3437_v32  ;;  %2606 = vmatpush2.bf16.msra.mxu0 %v3440_v33 }
 0x655   :  { %2566 = vmatprep.subr.bf16.mxu1 %v3445_v34  ;;  %2607 = vmatprep.subr.bf16.mxu0 %v3448_v35 }
 0x658   :  { %2567 = vmatpush2.bf16.msra.mxu1 %v3443_v36  ;;  %2608 = vmatpush2.bf16.msra.mxu0 %v3446_v37 }
 0x659   :  { %2568 = vmatprep.subr.bf16.mxu1 %v3451_v38  ;;  %2609 = vmatprep.subr.bf16.mxu0 %v3454_v39 }
 0x65c   :  { %2569 = vmatpush2.bf16.msra.mxu1 %v3449_v40  ;;  %2610 = vmatpush2.bf16.msra.mxu0 %v3452_v41 }
 0x65d   :  { %2570 = vmatprep.subr.bf16.mxu1 %v3457_v42  ;;  %2611 = vmatprep.subr.bf16.mxu0 %v3460_v43 }
 0x660   :  { %2571 = vmatpush2.bf16.msra.mxu1 %v3455_v44  ;;  %2612 = vmatpush2.bf16.msra.mxu0 %v3458_v46 }
 0x661   :  { %2572 = vmatprep.subr.bf16.mxu1 %v3463_v47  ;;  %2613 = vmatprep.subr.bf16.mxu0 %v3466_v48 }
 0x664   :  { %2573 = vmatpush2.bf16.msra.mxu1 %v3461_v49  ;;  %2614 = vmatpush2.bf16.msra.mxu0 %v3464_v50 }
 0x665   :  { %2574 = vmatprep.subr.bf16.mxu1 %v3469_v51  ;;  %2615 = vmatprep.subr.bf16.mxu0 %v3472_v52 }
 0x668   :  { %2575 = vmatpush2.bf16.msra.mxu1 %v3467_v53  ;;  %2616 = vmatpush2.bf16.msra.mxu0 %v3470_v54 }
 0x669   :  { %2576 = vmatprep.subr.bf16.mxu1 %v3475_v55  ;;  %2617 = vmatprep.subr.bf16.mxu0 %v3478_v56 }
 0x66c   :  { %2577 = vmatpush2.bf16.msra.mxu1 %v3473_v57  ;;  %2618 = vmatpush2.bf16.msra.mxu0 %v3476_v58 }
 0x6ef   :  { %v2094_v0 = vpop.f32.mrf.mxu1  ;;  %v2135_v1 = vpop.f32.mrf.mxu0 }
 0x6f0   :  { %v2095_v2 = vadd.f32 %v2094_v0, %v1723_v60  ;;  %v2136_v3 = vadd.f32 %v2135_v1, %v1731_v61 }
 0x6f1   :  { %v2096_v4 = vpop.f32.mrf.mxu1  ;;  %v2137_v5 = vpop.f32.mrf.mxu0 }
 0x6f2   :  { %v2097_v6 = vadd.f32 %v2096_v4, %v1727_v62  ;;  %v2138_v7 = vadd.f32 %v2137_v5, %v1735_v63  ;;  %v2142_v8 = vmax.f32 %v2095_v2, 0.0  ;;  %v2144_v9 = vmax.f32 %v2136_v3, 0.0 }
 0x6f3   :  { %v2098_v10 = vpop.f32.mrf.mxu1  ;;  %v2139_v11 = vpop.f32.mrf.mxu0 }
 0x6f4   :  { %v2143_v14 = vmax.f32 %v2097_v6, 0.0  ;;  %v2145_v17 = vmax.f32 %v2138_v7, 0.0  ;;  %v2146_v45 = vpack.c.bf16 %v2142_v8, %v2142_v8  ;;  %v2148_v16 = vpack.c.bf16 %v2144_v9, %v2144_v9 }
 0x6f5   :  { %v2099_v13 = vpop.f32.mrf.mxu1  ;;  %v2140_v18 = vpop.f32.mrf.mxu0 }
 0x6f6   :  { %v2147_v19 = vpack.c.bf16 %v2143_v14, %v2143_v14  ;;  %v2149_v20 = vpack.c.bf16 %v2145_v17, %v2145_v17 }
 0x6f8   :  { %2578 = vmatprep.mubr.bf16.mxu1 %v2147_v19  ;;  %2619 = vmatprep.mubr.bf16.mxu0 %v2149_v20 }
 0x6f9   :  { %2579 = vmatmul.mubr.bf16.vlgmr.msra.gmra.mxu1 %v2146_v45  ;;  %2620 = vmatmul.mubr.bf16.vlgmr.msra.gmra.mxu0 %v2148_v16 }
 0x6fa   :  { %3586 = shalt.err (!%p3583_p10)
}
 0x6fb   :  { %2675 = dma.vmem_to_hbm [thread:$0]  %s2673_s9, 32, %s3978_s21, [#allocation4]  }
 0x6fc   :  { %s3595_s1 = scalar_lea.vmem %s2683_s25, 32  ;;  %p3600_p12 = scmp.lt.s32.totalorder %s2683_s25, %s2683_s25 }
 0x6fd   :  { %p3596_p11 = scmp.ne.s32.totalorder %s2683_s25, %s3595_s1  ;;  %p3601_p13 = scmp.lt.s32.totalorder %s3595_s1, %s3595_s1 }
 0x6ff   :  { %p3602_p0 = por %p3601_p13, %p3600_p12 }
 0x701   :  { %p3603_p1 = pnand %p3602_p0, %p3596_p11 }
 0x703   :  { %3606 = shalt.err (!%p3603_p1)
}
 0x704   :  { %2685 = dma.vmem_to_hbm [thread:$0]  %s2683_s25, 32, %s3979_s22, [#allocation12]   ;;  %v2214_v21 = vld [vmem:[%s3976_s19] sm:$0x3] }
 0x705   :  { %v2219_v22 = vrot.slane %v2214_v21, %v3782_v12  ;;  %v2223_v23 = vrot.slane %v2214_v21, %v3789_v15  ;;  %s3996_s22 = sld [smem:[#allocation25_spill]] }
 0x7b9   :  { %v2580_v24 = vpop.f32.mrf.mxu1  ;;  %v2621_v25 = vpop.f32.mrf.mxu0 }
 0x7ba   :  { %v2581_v26 = vadd.f32 %v2580_v24, %v2219_v22 }
 0x7bb   :  { %v2582_v27 = vpop.f32.mrf.mxu1  ;;  %v2623_v28 = vpop.f32.mrf.mxu0 }
 0x7bc   :  { %v2622_v29 = vadd.f32 %v2621_v25, %v2581_v26  ;;  %v2583_v30 = vadd.f32 %v2582_v27, %v2223_v23 }
 0x7bd   :  { %v2584_v31 = vpop.f32.mrf.mxu1  ;;  %v2625_v32 = vpop.f32.mrf.mxu0 }
 0x7be   :  { %v2628_v33 = vsub.f32 0.0, %v2622_v29  ;;  %v2624_v34 = vadd.f32 %v2623_v28, %v2583_v30 }
 0x7bf   :  { %v2585_v35 = vpop.f32.mrf.mxu1  ;;  %v2626_v36 = vpop.f32.mrf.mxu0 }
 0x7c0   :  { %v2630_v37 = vmul.f32 1.442695, %v2628_v33  ;;  %v2629_v38 = vsub.f32 0.0, %v2624_v34 }
 0x7c2   :  { %3487 = vpow2.f32 %v2630_v37  ;;  %v2632_v39 = vmul.f32 1.442695, %v2629_v38 }
 0x7c4   :  { %3489 = vpow2.f32 %v2632_v39 }
 0x7cf   :  { %v3488_v12 = vpop.eup %3487 }
 0x7d0   :  { %v2634_v15 = vadd.f32 1.0, %v3488_v12 }
 0x7d1   :  { %v3490_v40 = vpop.eup %3489 }
 0x7d2   :  { %v2635_v41 = vadd.f32 1.0, %v3490_v40  ;;  %3491 = vrcp.f32 %v2634_v15 }
 0x7d4   :  { %3493 = vrcp.f32 %v2635_v41 }
 0x7df   :  { %v3492_v42 = vpop.eup %3491 }
 0x7e1   :  { %v3494_v43 = vpop.eup %3493 }
 0x7e2   :  { %v2642_v44 = vcombine.low %v3492_v42, %v3494_v43 }
 0x7e4   :  { %2995 = vst.sshfl [vmem:[%s3996_s22] sm:$0x33 pattern:$0x76325410] %v2642_v44 }
 0x7e5   :  { %3621 = dma.done.wait [#allocation4], 32  }
 0x7e6   :  { %3622 = vsyncadd [#allocation4], 4294967264 }
 0x7e7   :  { %3623 = dma.done.wait [#allocation12], 32  }
 0x7e8   :  { %3624 = vsyncadd [#allocation12], 4294967264 }
 0x7e9   :  { %2694 = vsyncpa [#allocation3], 1 }
 0x7ea   :  { %2695 = vsyncpa [#allocation6], 1 }
 0x7eb   :  { %2696 = vsyncpa [#allocation9], 1 }
 0x7ec   :  { %2697 = vsyncpa [#allocation4], 1 }
 0x7ed   :  { %2698 = vsyncpa [#allocation12], 1 }

</bundles_post_ra>
